<compile_context>
chip_gen: v6e
topology: v6e:2x2x1
jax: 0.10.0
libtpu: 0.0.40
codegen_flags: <defaults>
</compile_context>

<pallas_src>
import jax
import jax.numpy as jnp
from jax.experimental import pallas as pl
from jax.experimental.pallas import tpu as pltpu

NUM_ITEMS = 256      # synthetic stand-in for df.movieId.unique().shape[0]
H1, H2    = 50, 10   # logical hidden sizes from the module definition
H1P, H2P  = 128, 128 # lane-padded hidden sizes (zero padding, math unchanged)
TB        = 256      # batch rows per grid step
TN        = 128      # fc4 output-column tile (lane-dense)
BATCH     = 1024     # example batch -> 4 "parallel" batch steps x 2 N steps


def net_kernel(x_ref,
               w1_ref, b1_ref,
               w2_ref, b2_ref,
               w3_ref, b3_ref,
               w4_ref, b4_ref,
               o_ref,
               h_ref):
    """Fused MLP forward for one (TB, NUM_ITEMS) x tile and (TB, TN) out tile.

    Grid = (batch tiles ["parallel"], fc4 output-column tiles ["arbitrary"]).
    The hidden stack is recomputed only when the output-column index resets;
    for j > 0 only the cached bf16 hidden activations and a new w4/b4 column
    block are touched.
    """
    j = pl.program_id(1)

    @pl.when(j == 0)
    def _():
        # fc1 + sigmoid: cast the f32 x tile to bf16 in-kernel (VPU), bf16 MXU
        # dot with f32 accumulation, activation in f32.
        x = x_ref[...].astype(jnp.bfloat16)
        h = jnp.dot(x, w1_ref[...], preferred_element_type=jnp.float32)
        h = jax.nn.sigmoid(h + b1_ref[...])
        # fc2 + tanh (bf16 MXU, f32 accumulation/activation)
        h = jnp.dot(h.astype(jnp.bfloat16), w2_ref[...],
                    preferred_element_type=jnp.float32)
        h = jnp.tanh(h + b2_ref[...])
        # fc3 + sigmoid
        h = jnp.dot(h.astype(jnp.bfloat16), w3_ref[...],
                    preferred_element_type=jnp.float32)
        h = jax.nn.sigmoid(h + b3_ref[...])
        h_ref[...] = h.astype(jnp.bfloat16)

    # fc4 (linear output) against this step's w4/b4 column block.
    out = jnp.dot(h_ref[...], w4_ref[...],
                  preferred_element_type=jnp.float32) + b4_ref[...]
    o_ref[...] = out.astype(o_ref.dtype)


def net_forward(x, params):
    """One pallas_call, grid = (batch tiles, fc4 output-column tiles)."""
    (w1, b1, w2, b2, w3, b3, w4, b4) = params
    B, F = x.shape
    assert F == NUM_ITEMS
    assert NUM_ITEMS % TN == 0

    # Pad batch to a multiple of TB so every tile is full; slice back after.
    Bp = pl.cdiv(B, TB) * TB
    if Bp != B:
        x = jnp.pad(x, ((0, Bp - B), (0, 0)))

    def resident(arr):
        # Constant index_map => the block stays VMEM-resident across all grid
        # steps; Buffered(1) drops the (useless) second pipeline buffer.
        return pl.BlockSpec(arr.shape, lambda i, j: (0, 0),
                            pipeline_mode=pl.Buffered(1))

    # Explicit VMEM budget: single-buffered residents + double-buffered
    # streaming tiles + scratch, with headroom; clamped below physical VMEM.
    resident_bytes = sum(int(a.size) * a.dtype.itemsize
                         for a in (w1, b1, w2, b2, w3, b3))
    stream_bytes = 2 * (TB * NUM_ITEMS * 4          # x tile (f32 in)
                        + H1P * TN * 2 + TN * 4     # w4 / b4 column blocks
                        + TB * TN * 2)              # out tile (bf16)
    scratch_bytes = TB * H1P * 2
    vmem_limit = min(64 << 20,
                     max(16 << 20,
                         2 * (resident_bytes + stream_bytes + scratch_bytes)))

    out = pl.pallas_call(
        net_kernel,
        out_shape=jax.ShapeDtypeStruct((Bp, NUM_ITEMS), jnp.bfloat16),
        grid=(Bp // TB, NUM_ITEMS // TN),
        in_specs=[
            pl.BlockSpec((TB, NUM_ITEMS), lambda i, j: (i, 0)),  # x batch tile
            resident(w1), resident(b1),
            resident(w2), resident(b2),
            resident(w3), resident(b3),
            pl.BlockSpec((H1P, TN), lambda i, j: (0, j)),        # w4 col block
            pl.BlockSpec((1, TN), lambda i, j: (0, j)),          # b4 col block
        ],
        out_specs=pl.BlockSpec((TB, TN), lambda i, j: (i, j)),
        scratch_shapes=[pltpu.VMEM((TB, H1P), jnp.bfloat16)],    # cached hidden
        compiler_params=pltpu.CompilerParams(
            dimension_semantics=("parallel", "arbitrary"),
            vmem_limit_bytes=int(vmem_limit)),
    )(x, w1, b1, w2, b2, w3, b3, w4, b4)
    return out[:B]


def init_params(key):
    """PyTorch-style Linear init U(-1/sqrt(fan_in), 1/sqrt(fan_in)).

    Weights are stored (in_features, out_features) in bf16, zero-padded to
    lane-aligned shapes.  Padding is consistent across layers: padded output
    columns of layer k and padded input rows of layer k+1 (plus the matching
    bias entries) are all zero, so padded hidden units (sigmoid(0)=0.5)
    never leak into the logical outputs.
    """
    def linear(key, fan_in, fan_out, pad_in, pad_out):
        kw, kb = jax.random.split(key)
        bound = 1.0 / jnp.sqrt(fan_in)
        w = jax.random.uniform(kw, (fan_in, fan_out), jnp.float32, -bound, bound)
        b = jax.random.uniform(kb, (1, fan_out), jnp.float32, -bound, bound)
        w = jnp.pad(w, ((0, pad_in - fan_in), (0, pad_out - fan_out)))
        b = jnp.pad(b, ((0, 0), (0, pad_out - fan_out)))
        return w.astype(jnp.bfloat16), b  # weights bf16 (MXU path), bias f32

    k1, k2, k3, k4 = jax.random.split(key, 4)
    w1, b1 = linear(k1, NUM_ITEMS, H1, NUM_ITEMS, H1P)
    w2, b2 = linear(k2, H1, H2, H1P, H2P)
    w3, b3 = linear(k3, H2, H1, H2P, H1P)
    w4, b4 = linear(k4, H1, NUM_ITEMS, H1P, NUM_ITEMS)
    return (w1, b1, w2, b2, w3, b3, w4, b4)


def reference_forward(x, params):
    """Pure-JAX f32 reference using the same (bf16-quantized, padded) params."""
    (w1, b1, w2, b2, w3, b3, w4, b4) = params
    w1, w2, w3, w4 = (w.astype(jnp.float32) for w in (w1, w2, w3, w4))
    x = x.astype(jnp.bfloat16).astype(jnp.float32)   # same input quantization
    h = jax.nn.sigmoid(x @ w1 + b1)
    h = jnp.tanh(h @ w2 + b2)
    h = jax.nn.sigmoid(h @ w3 + b3)
    return h @ w4 + b4


if __name__ == "__main__":
    key = jax.random.PRNGKey(0)
    kx, kp = jax.random.split(key)
    x = jax.random.uniform(kx, (BATCH, NUM_ITEMS), jnp.float32, 0.0, 5.0)
    params = init_params(kp)

    out = net_forward(x, params)
    out = jax.block_until_ready(out)

    ref = reference_forward(x, params)
    assert out.shape == (BATCH, NUM_ITEMS)
    assert out.dtype == jnp.bfloat16
    # bf16 weights / hidden activations / output widen error vs the f32 ref.
    assert jnp.allclose(out.astype(jnp.float32), ref, atol=3e-2, rtol=3e-2), \
        "mismatch vs reference"

    print("KERNEL_OK")
</pallas_src>

<mosaic_0001>
module attributes {stable_mosaic.version = 11 : i64} {
  func.func @net_kernel(%arg0: i32, %arg1: i32, %arg2: memref<256x256xf32, #tpu.memory_space<vmem>>, %arg3: memref<256x128xbf16, #tpu.memory_space<vmem>>, %arg4: memref<1x128xf32, #tpu.memory_space<vmem>>, %arg5: memref<128x128xbf16, #tpu.memory_space<vmem>>, %arg6: memref<1x128xf32, #tpu.memory_space<vmem>>, %arg7: memref<128x128xbf16, #tpu.memory_space<vmem>>, %arg8: memref<1x128xf32, #tpu.memory_space<vmem>>, %arg9: memref<128x128xbf16, #tpu.memory_space<vmem>>, %arg10: memref<1x128xf32, #tpu.memory_space<vmem>>, %arg11: memref<256x128xbf16, #tpu.memory_space<vmem>>, %arg12: memref<256x128xbf16, #tpu.memory_space<vmem>>) attributes {dimension_semantics = [#tpu.dimension_semantics<parallel>, #tpu.dimension_semantics<arbitrary>], iteration_bounds = array<i64: 4, 2>, scalar_prefetch = 0 : i64, scratch_operands = 1 : i64, tpu.core_type = #tpu.core_type<tc>, window_params = [{transform_indices = @transform_0, window_bounds = array<i64: 256, 256>}, {pipeline_mode = #tpu.pipeline_mode<synchronous>, transform_indices = @transform_1, window_bounds = array<i64: 256, 128>}, {pipeline_mode = #tpu.pipeline_mode<synchronous>, transform_indices = @transform_2, window_bounds = array<i64: 1, 128>}, {pipeline_mode = #tpu.pipeline_mode<synchronous>, transform_indices = @transform_3, window_bounds = array<i64: 128, 128>}, {pipeline_mode = #tpu.pipeline_mode<synchronous>, transform_indices = @transform_4, window_bounds = array<i64: 1, 128>}, {pipeline_mode = #tpu.pipeline_mode<synchronous>, transform_indices = @transform_5, window_bounds = array<i64: 128, 128>}, {pipeline_mode = #tpu.pipeline_mode<synchronous>, transform_indices = @transform_6, window_bounds = array<i64: 1, 128>}, {transform_indices = @transform_7, window_bounds = array<i64: 128, 128>}, {transform_indices = @transform_8, window_bounds = array<i64: 1, 128>}, {transform_indices = @transform_9, window_bounds = array<i64: 256, 128>}]} {
    %c0_i32 = arith.constant 0 : i32
    %0 = arith.cmpi eq, %arg1, %c0_i32 : i32
    %1 = arith.extui %0 : i1 to i32
    %c0_i32_0 = arith.constant 0 : i32
    %2 = arith.cmpi ne, %1, %c0_i32_0 : i32
    scf.if %2 {
      %c0_8 = arith.constant 0 : index
      %c0_9 = arith.constant 0 : index
      %11 = vector.load %arg2[%c0_8, %c0_9] : memref<256x256xf32, #tpu.memory_space<vmem>>, vector<256x256xf32>
      %12 = arith.truncf %11 : vector<256x256xf32> to vector<256x256xbf16>
      %c0_10 = arith.constant 0 : index
      %c0_11 = arith.constant 0 : index
      %13 = vector.load %arg3[%c0_10, %c0_11] : memref<256x128xbf16, #tpu.memory_space<vmem>>, vector<256x128xbf16>
      %cst_12 = arith.constant dense<0.000000e+00> : vector<256x128xf32>
      %14 = tpu.matmul %12, %13, %cst_12 {dimension_numbers = #tpu.dot_dimension_numbers<[1], [0], [0], [1], [0, 0, 1, 1], [], []>} : vector<256x256xbf16>, vector<256x128xbf16>, vector<256x128xf32> -> vector<256x128xf32>
      %c0_13 = arith.constant 0 : index
      %c0_14 = arith.constant 0 : index
      %15 = vector.load %arg4[%c0_13, %c0_14] : memref<1x128xf32, #tpu.memory_space<vmem>>, vector<1x128xf32>
      %16 = vector.broadcast %15 : vector<1x128xf32> to vector<256x128xf32>
      %17 = arith.addf %14, %16 : vector<256x128xf32>
      %18 = arith.negf %17 : vector<256x128xf32>
      %19 = math.exp %18 : vector<256x128xf32>
      %cst_15 = arith.constant 1.000000e+00 : f32
      %20 = vector.broadcast %cst_15 : f32 to vector<256x128xf32>
      %21 = arith.addf %20, %19 : vector<256x128xf32>
      %22 = arith.divf %20, %21 : vector<256x128xf32>
      %23 = arith.truncf %22 : vector<256x128xf32> to vector<256x128xbf16>
      %c0_16 = arith.constant 0 : index
      %c0_17 = arith.constant 0 : index
      %24 = vector.load %arg5[%c0_16, %c0_17] : memref<128x128xbf16, #tpu.memory_space<vmem>>, vector<128x128xbf16>
      %cst_18 = arith.constant dense<0.000000e+00> : vector<256x128xf32>
      %25 = tpu.matmul %23, %24, %cst_18 {dimension_numbers = #tpu.dot_dimension_numbers<[1], [0], [0], [1], [0, 0, 1, 1], [], []>} : vector<256x128xbf16>, vector<128x128xbf16>, vector<256x128xf32> -> vector<256x128xf32>
      %c0_19 = arith.constant 0 : index
      %c0_20 = arith.constant 0 : index
      %26 = vector.load %arg6[%c0_19, %c0_20] : memref<1x128xf32, #tpu.memory_space<vmem>>, vector<1x128xf32>
      %27 = vector.broadcast %26 : vector<1x128xf32> to vector<256x128xf32>
      %28 = arith.addf %25, %27 : vector<256x128xf32>
      %29 = math.tanh %28 : vector<256x128xf32>
      %30 = arith.truncf %29 : vector<256x128xf32> to vector<256x128xbf16>
      %c0_21 = arith.constant 0 : index
      %c0_22 = arith.constant 0 : index
      %31 = vector.load %arg7[%c0_21, %c0_22] : memref<128x128xbf16, #tpu.memory_space<vmem>>, vector<128x128xbf16>
      %cst_23 = arith.constant dense<0.000000e+00> : vector<256x128xf32>
      %32 = tpu.matmul %30, %31, %cst_23 {dimension_numbers = #tpu.dot_dimension_numbers<[1], [0], [0], [1], [0, 0, 1, 1], [], []>} : vector<256x128xbf16>, vector<128x128xbf16>, vector<256x128xf32> -> vector<256x128xf32>
      %c0_24 = arith.constant 0 : index
      %c0_25 = arith.constant 0 : index
      %33 = vector.load %arg8[%c0_24, %c0_25] : memref<1x128xf32, #tpu.memory_space<vmem>>, vector<1x128xf32>
      %34 = vector.broadcast %33 : vector<1x128xf32> to vector<256x128xf32>
      %35 = arith.addf %32, %34 : vector<256x128xf32>
      %36 = arith.negf %35 : vector<256x128xf32>
      %37 = math.exp %36 : vector<256x128xf32>
      %cst_26 = arith.constant 1.000000e+00 : f32
      %38 = vector.broadcast %cst_26 : f32 to vector<256x128xf32>
      %39 = arith.addf %38, %37 : vector<256x128xf32>
      %40 = arith.divf %38, %39 : vector<256x128xf32>
      %41 = arith.truncf %40 : vector<256x128xf32> to vector<256x128xbf16>
      %c0_27 = arith.constant 0 : index
      %c0_28 = arith.constant 0 : index
      %42 = vector.load %arg12[%c0_27, %c0_28] : memref<256x128xbf16, #tpu.memory_space<vmem>>, vector<256x128xbf16>
      tpu.vector_store %arg12[%c0_27, %c0_28], %41 {strides = array<i32>} : memref<256x128xbf16, #tpu.memory_space<vmem>>, vector<256x128xbf16>,
    } else {
    }
    %c0 = arith.constant 0 : index
    %c0_1 = arith.constant 0 : index
    %3 = vector.load %arg12[%c0, %c0_1] : memref<256x128xbf16, #tpu.memory_space<vmem>>, vector<256x128xbf16>
    %c0_2 = arith.constant 0 : index
    %c0_3 = arith.constant 0 : index
    %4 = vector.load %arg9[%c0_2, %c0_3] : memref<128x128xbf16, #tpu.memory_space<vmem>>, vector<128x128xbf16>
    %cst = arith.constant dense<0.000000e+00> : vector<256x128xf32>
    %5 = tpu.matmul %3, %4, %cst {dimension_numbers = #tpu.dot_dimension_numbers<[1], [0], [0], [1], [0, 0, 1, 1], [], []>} : vector<256x128xbf16>, vector<128x128xbf16>, vector<256x128xf32> -> vector<256x128xf32>
    %c0_4 = arith.constant 0 : index
    %c0_5 = arith.constant 0 : index
    %6 = vector.load %arg10[%c0_4, %c0_5] : memref<1x128xf32, #tpu.memory_space<vmem>>, vector<1x128xf32>
    %7 = vector.broadcast %6 : vector<1x128xf32> to vector<256x128xf32>
    %8 = arith.addf %5, %7 : vector<256x128xf32>
    %9 = arith.truncf %8 : vector<256x128xf32> to vector<256x128xbf16>
    %c0_6 = arith.constant 0 : index
    %c0_7 = arith.constant 0 : index
    %10 = vector.load %arg11[%c0_6, %c0_7] : memref<256x128xbf16, #tpu.memory_space<vmem>>, vector<256x128xbf16>
    tpu.vector_store %arg11[%c0_6, %c0_7], %9 {strides = array<i32>} : memref<256x128xbf16, #tpu.memory_space<vmem>>, vector<256x128xbf16>,
    return
  }
  func.func @transform_0(%arg0: i32, %arg1: i32) -> (i32, i32) {
    %c0_i32 = arith.constant 0 : i32
    %c0_i32_0 = arith.constant 0 : i32
    return %arg0, %c0_i32 : i32, i32
  }
  func.func @transform_1(%arg0: i32, %arg1: i32) -> (i32, i32) {
    %c0_i32 = arith.constant 0 : i32
    %c0_i32_0 = arith.constant 0 : i32
    %c0_i32_1 = arith.constant 0 : i32
    return %c0_i32, %c0_i32_0 : i32, i32
  }
  func.func @transform_2(%arg0: i32, %arg1: i32) -> (i32, i32) {
    %c0_i32 = arith.constant 0 : i32
    %c0_i32_0 = arith.constant 0 : i32
    %c0_i32_1 = arith.constant 0 : i32
    return %c0_i32, %c0_i32_0 : i32, i32
  }
  func.func @transform_3(%arg0: i32, %arg1: i32) -> (i32, i32) {
    %c0_i32 = arith.constant 0 : i32
    %c0_i32_0 = arith.constant 0 : i32
    %c0_i32_1 = arith.constant 0 : i32
    return %c0_i32, %c0_i32_0 : i32, i32
  }
  func.func @transform_4(%arg0: i32, %arg1: i32) -> (i32, i32) {
    %c0_i32 = arith.constant 0 : i32
    %c0_i32_0 = arith.constant 0 : i32
    %c0_i32_1 = arith.constant 0 : i32
    return %c0_i32, %c0_i32_0 : i32, i32
  }
  func.func @transform_5(%arg0: i32, %arg1: i32) -> (i32, i32) {
    %c0_i32 = arith.constant 0 : i32
    %c0_i32_0 = arith.constant 0 : i32
    %c0_i32_1 = arith.constant 0 : i32
    return %c0_i32, %c0_i32_0 : i32, i32
  }
  func.func @transform_6(%arg0: i32, %arg1: i32) -> (i32, i32) {
    %c0_i32 = arith.constant 0 : i32
    %c0_i32_0 = arith.constant 0 : i32
    %c0_i32_1 = arith.constant 0 : i32
    return %c0_i32, %c0_i32_0 : i32, i32
  }
  func.func @transform_7(%arg0: i32, %arg1: i32) -> (i32, i32) {
    %c0_i32 = arith.constant 0 : i32
    %c0_i32_0 = arith.constant 0 : i32
    return %c0_i32, %arg1 : i32, i32
  }
  func.func @transform_8(%arg0: i32, %arg1: i32) -> (i32, i32) {
    %c0_i32 = arith.constant 0 : i32
    %c0_i32_0 = arith.constant 0 : i32
    return %c0_i32, %arg1 : i32, i32
  }
  func.func @transform_9(%arg0: i32, %arg1: i32) -> (i32, i32) {
    %c0_i32 = arith.constant 0 : i32
    return %arg0, %arg1 : i32, i32
  }
}

</mosaic_0001>

<bundles_post_ra>
// kernel: tpu_custom_call.1
= control target key start
LH: loop header
LB: loop body
LE: loop exit
PB: predicated region body
PF: predicated region fallthrough
CT: control target
= control target key end

     0   :  { %s4921_s0 = inlined_call_operand.hbm [shape: f32[1024,256], index: 0, kind: input, shape index: {}]   ;;  %s4922_s1 = inlined_call_operand.hbm [shape: bf16[256,128], index: 1, kind: input, shape index: {}]   ;;  %s4923_s2 = inlined_call_operand.vmem [shape: f32[1,128], index: 2, kind: input, shape index: {}]   ;;  %s4924_s3 = inlined_call_operand.hbm [shape: bf16[128,128], index: 3, kind: input, shape index: {}]   ;;  %s4925_s4 = inlined_call_operand.vmem [shape: f32[1,128], index: 4, kind: input, shape index: {}]   ;;  %s4926_s5 = inlined_call_operand.hbm [shape: bf16[128,128], index: 5, kind: input, shape index: {}]   ;;  %s4927_s6 = inlined_call_operand.vmem [shape: f32[1,128], index: 6, kind: input, shape index: {}]   ;;  %s4928_s7 = inlined_call_operand.hbm [shape: bf16[128,256], index: 7, kind: input, shape index: {}]   ;;  %s4929_s8 = inlined_call_operand.vmem [shape: f32[1,256], index: 8, kind: input, shape index: {}]   ;;  %s4930_s9 = inlined_call_operand.hbm [shape: bf16[1024,256], index: 9, kind: output, shape index: {}]  }
   0x1   :  { %4957 = sst [smem:[#allocation31_spill]] %s4922_s1 }
   0x2   :  { %4958 = sst [smem:[#allocation32_spill]] %s4923_s2 }
   0x3   :  { %4959 = sst [smem:[#allocation33_spill]] %s4925_s4 }
   0x4   :  { %4960 = sst [smem:[#allocation34_spill]] %s4927_s6 }
   0x5   :  { %4961 = sst [smem:[#allocation35_spill]] %s4929_s8 }
   0x6   :  { %4962 = sst [smem:[#allocation36_spill]] %s4930_s9 }
   0x7   :  { %14 = vsyncpa [#allocation4], 0 }
   0x8   :  { %16 = vsyncpa [#allocation4 + $0x1], 0 }
   0x9   :  { %17 = vsyncpa [#allocation7], 0 }
   0xa   :  { %18 = vsyncpa [#allocation10], 0 }
   0xb   :  { %19 = vsyncpa [#allocation5], 0 }
   0xc   :  { %21 = vsyncpa [#allocation5 + $0x1], 0  ;;  %s4329_s30 = smov 0   ;;  %s4331_s10 = smov 0  }
   0xd   :  { %s4333_s11 = smov 0   ;;  %s4335_s12 = smov 0  }
   0xe   :  { %s4337_s13 = smov 0   ;;  %s4339_s14 = smov 0  }
   0xf   :  { %s4341_s15 = smov 0   ;;  %s4343_s16 = smov 0  }
  0x10   :  { %s4345_s17 = smov 0   ;;  %s4347_s18 = smov 0  }
  0x11   :  { %s4349_s19 = smov 0   ;;  %s4351_s20 = smov 0  }
  0x12   :  { %s4353_s21 = smov 0   ;;  %s4355_s22 = smov 0  }
  0x13 LB: > { %4963 = sst [smem:[#allocation18_spill]] %s4211_s30  ;;  %s4396_s23 = sadd.s32 4294967295, %s4263_s22   ;;  %s4263_s22 = sphi %s4355_s22, %s27_s22   ;;  %s4259_s21 = sphi %s4353_s21, %s5035_s21   ;;  %s4255_s20 = sphi %s4351_s20, %s5034_s20   ;;  %s4251_s19 = sphi %s4349_s19, %s5033_s19   ;;  %s4247_s18 = sphi %s4347_s18, %s5032_s18   ;;  %s4243_s17 = sphi %s4345_s17, %s5031_s17   ;;  %s4239_s16 = sphi %s4343_s16, %s5030_s16   ;;  %s4235_s15 = sphi %s4341_s15, %s5023_s15   ;;  %s4231_s14 = sphi %s4339_s14, %s5029_s14   ;;  %s4227_s13 = sphi %s4337_s13, %s5028_s13   ;;  %s4223_s12 = sphi %s4335_s12, %s5021_s12   ;;  %s4219_s11 = sphi %s4333_s11, %s5027_s11   ;;  %s4215_s10 = sphi %s4331_s10, %s5026_s10   ;;  %s4211_s30 = sphi %s4329_s30, %s5020_s30  }
  0x14   : > { %4964 = sst [smem:[#allocation19_spill]] %s4215_s10  ;;  %s2612_s24 = sadd.s32 4294967294, %s4263_s22  }
  0x15   : > { %4965 = sst [smem:[#allocation20_spill]] %s4227_s13  ;;  %p59_p0 = scmp.ne.s32.totalorder %s4239_s16, %s4235_s15 }
  0x16   : > { %4966 = sst [smem:[#allocation21_spill]] %s4239_s16  ;;  %p4952_p1 = scmp.eq.s32.totalorder %s4396_s23, 0 }
  0x17   : > { %4967 = sst [smem:[#allocation22_spill]] %s4247_s18  ;;  %p211_p3 = scmp.ne.s32.totalorder %s4227_s13, %s4223_s12 }
  0x18   : > { %4968 = sst [smem:[#allocation23_spill]] %s4251_s19  ;;  %p4406_p4 = por %p4952_p1, %p59_p0 }
  0x19   : > { %p262_p5 = scmp.ne.s32.totalorder %s4219_s11, %s4215_s10  ;;  %p4414_p6 = por %p211_p3, %p4952_p1 }
  0x1a   : > { %s4969_s25 = scalar_select %p4406_p4, 1, 0 }
  0x1b   : > { %s4971_s26 = scalar_select %p4414_p6, 1, 0 }
  0x1c   : > { %4970 = sst [smem:[#allocation24_spill]] %s4969_s25  ;;  %p263_p7 = scmp.eq.s32.totalorder %s4396_s23, 7 }
  0x1d   : > { %4972 = sst [smem:[#allocation25_spill]] %s4971_s26  ;;  %p268_p8 = scmp.ne.s32.totalorder %s4215_s10, %s4211_s30 }
  0x1e   : > { %p269_p9 = scmp.eq.s32.totalorder %s2612_s24, 7  ;;  %p4421_p10 = por %p263_p7, %p262_p5 }
  0x1f   : > { %p2613_p11 = scmp.ge.s32.totalorder %s4263_s22, 1  ;;  %p276_p13 = scmp.lt.s32.totalorder %s4263_s22, 9 }
  0x20   : > { %s4973_s27 = scalar_select %p4421_p10, 1, 0 }
  0x21   : > { %p4426_p12 = por %p269_p9, %p268_p8  ;;  %p4431_p0 = pnand %p2613_p11, %p276_p13 }
  0x22   : > { %4974 = sst [smem:[#allocation26_spill]] %s4973_s27  ;;  %s4265_s12 = smov [#allocation6]  }
  0x23   : > { %s4975_s28 = scalar_select %p4426_p12, 1, 0 }
  0x24   : > { %s288_s15 = sshll.u32 %s4265_s12, 4  ;;  %p3445_p3 = pneg %p4431_p0  ;;  %s289_s15 = int_to_ptr.vmem [resolvable:$true] %s288_s15 }
  0x25   : > { %4976 = sst [smem:[#allocation27_spill]] %s4975_s28  ;;  %s3984_s28 = scalar_lea.vmem %s289_s15, 2048 }
  0x26   : > { %p4439_p5 = pnand %p3445_p3, %p4952_p1  ;;  %p3985_p8 = scmp.ne.s32.totalorder %s289_s15, %s3984_s28 }
  0x27   : > { %p3992_p13 = scmp.lt.s32.totalorder %s289_s15, %s289_s15  ;;  %p3993_p2 = scmp.lt.s32.totalorder %s3984_s28, %s3984_s28 }
  0x28   : > { %p4953_p7 = pneg %p4439_p5 }
  0x29   : > { %p3994_p12 = por %p3993_p2, %p3992_p13 }
  0x2a   : > { %p3987_p9 = pnand %p3985_p8, %p4953_p7 }
  0x2c   : > { %p3988_p11 = pneg %p3987_p9 }
  0x2e   : > { %p3995_p10 = pnand %p3994_p12, %p3988_p11 }
  0x30   : > { %3998 = shalt.err (!%p3995_p10)
}
  0x31   : > { %s4937_s12 = smov 64   ;;  %s4939_s30 = smov 4  }
  0x32   : > { %s4979_s1 = sld [smem:[#allocation31_spill]]  ;;  %s36_s27 = sadd.s32 1, %s4255_s20 }
  0x33   : > { %p37_p2 = scmp.ge.s32.totalorder %s36_s27, 2  ;;  %s39_s19 = sadd.s32 1, %s4259_s21 }
  0x34   : > { %s46_s6 = sadd.s32 1, %s4243_s17  ;;  %p53_p10 = scmp.ne.s32.totalorder %s4243_s17, %s4239_s16 }
  0x35   : > { %s5037_s27 = smov (%p37_p2, %s36_s27), 0  ;;  %s5039_s19 = smov (!%p37_p2, %s39_s19), %s4259_s21 }
  0x36   : > { %4980 = sst [smem:[#allocation28_spill]] %s5037_s27  ;;  %p54_p12 = scmp.eq.s32.totalorder %s4263_s22, 0 }
  0x37   : > { %s195_s9 = ssub.s32 %s4255_s20, %s5037_s27  ;;  %p41_p3 = scmp.ge.s32.totalorder %s5039_s19, 4 }
  0x38   : > { %3448 = dma.hbm_to_vmem [thread:$0]  (!%p4439_p5), %s4979_s1, 2048, %s289_s15, [#allocation7], %s4937_s12, %s4937_s12, %s4939_s30  }
  0x39   : > { %p196_p8 = scmp.eq.s32.totalorder %s195_s9, 0  ;;  %p4467_p9 = por %p54_p12, %p53_p10 }
  0x3a   : > { %s198_s28 = sadd.s32 1, %s4231_s14  ;;  %s5041_s19 = smov (%p41_p3, %s5039_s19), 0 }
  0x3b   : > { %4982 = sst [smem:[#allocation29_spill]] %s5041_s19  ;;  %s43_s30 = ssub.s32 %s4259_s21, %s5041_s19 }
  0x3c   : > { %s4475_s12 = scalar_select %p196_p8, %s4231_s14, %s198_s28  }
  0x3d   : > { %p4984_p11 = scmp.ne.s32.totalorder %s4231_s14, %s4227_s13  ;;  %p44_p2 = scmp.eq.s32.totalorder %s43_s30, 0 }
  0x3e   : > { %4983 = sst [smem:[#allocation30_spill]] %s4475_s12  ;;  %s249_s27 = sor.u32 %s195_s9, %s43_s30 }
  0x3f   : > { %p4482_p13 = por %p4984_p11, %p54_p12  ;;  %p250_p10 = scmp.eq.s32.totalorder %s249_s27, 0 }
  0x40   : > { %s252_s4 = sadd.s32 1, %s4219_s11  ;;  %p4954_p3 = scmp.lt.s32.totalorder %s4263_s22, 8 }
  0x41   : > { %s4488_s2 = scalar_select %p44_p2, %s4243_s17, %s46_s6  }
  0x42   : > { %s4491_s8 = scalar_select %p250_p10, %s4219_s11, %s252_s4  }
  0x43   : > { %s337_s18 = sand.u32 1, %s4263_s22   ;;  %s339_s28 = sand.u32 1, %s4243_s17  }
  0x44   : > { %s2618_s12 = sshll.u32 %s339_s28, 9  ;;  %s2827_s19 = sshll.u32 %s4259_s21, 13 }
  0x45   : > { %s348_s13 = scalar_lea.hbm %s4921_s0, %s2827_s19  ;;  %s341_s25 = scalar_lea.vmem [#allocation3], %s2618_s12 }
  0x46   : > { %s349_s16 = sshll.u32 %s341_s25, 4  ;;  %p4504_p12 = pnand %p4954_p3, %p4467_p9  ;;  %s350_s16 = int_to_ptr.vmem [resolvable:$true] %s349_s16 }
  0x47   : > { %s4508_s4 = scalar_lea.sflag [#allocation4], %s337_s18  ;;  %s4012_s6 = scalar_lea.vmem %s350_s16, 8192 }
  0x48   : > { %p4001_p8 = pneg %p4504_p12  ;;  %p4013_p11 = scmp.ne.s32.totalorder %s350_s16, %s4012_s6 }
  0x49   : > { %s4268_s10 = smov [#allocation3]  }
  0x4a   : > { %p4015_p2 = pnand %p4013_p11, %p4001_p8  ;;  %s4017_s19 = sshll.u32 %s4268_s10, 4  ;;  %s4018_s19 = int_to_ptr.vmem [resolvable:$false] %s4017_s19 }
  0x4b   : > { %s4019_s25 = scalar_lea.vmem %s4018_s19, 16384  ;;  %p4020_p1 = scmp.lt.s32.totalorder %s350_s16, %s4018_s19 }
  0x4c   : > { %p4016_p10 = pneg %p4015_p2  ;;  %p4021_p7 = scmp.lt.s32.totalorder %s4019_s25, %s4012_s6 }
  0x4e   : > { %p4022_p9 = por %p4021_p7, %p4020_p1 }
  0x50   : > { %p4023_p3 = pnand %p4022_p9, %p4016_p10 }
  0x52   : > { %4026 = shalt.err (!%p4023_p3)
}
  0x53   : > { %s4269_s26 = smov 256   ;;  %s4270_s18 = smov 16  }
  0x54   : > { %3458 = dma.hbm_to_vmem [thread:$0]  (!%p4504_p12), %s348_s13, 8192, %s350_s16, %s4508_s4, %s4269_s26, %s4269_s26, %s4270_s18  }
  0x55   : > { %p4987_p8 = scmp.lt.s32.totalorder %s4263_s22, 8  ;;  %s4271_s12 = smov [#allocation8]  }
  0x56   : > { %s304_s9 = sshll.u32 %s4271_s12, 4  ;;  %p4989_p7 = pneg %p4439_p5  ;;  %s305_s9 = int_to_ptr.vmem [resolvable:$true] %s304_s9 }
  0x57   : > { %p4519_p11 = pnand %p4987_p8, %p4482_p13  ;;  %s4038_s15 = scalar_lea.vmem %s305_s9, 1024 }
  0x58   : > { %p4039_p1 = scmp.ne.s32.totalorder %s305_s9, %s4038_s15  ;;  %p4046_p10 = scmp.lt.s32.totalorder %s305_s9, %s305_s9 }
  0x59   : > { %p4047_p9 = scmp.lt.s32.totalorder %s4038_s15, %s4038_s15 }
  0x5a   : > { %p4041_p3 = pnand %p4039_p1, %p4989_p7 }
  0x5b   : > { %p4048_p6 = por %p4047_p9, %p4046_p10 }
  0x5c   : > { %p4042_p2 = pneg %p4041_p3 }
  0x5e   : > { %p4049_p4 = pnand %p4048_p6, %p4042_p2 }
  0x60   : > { %4052 = shalt.err (!%p4049_p4)
}
  0x61   : > { %s4990_s1 = smov 4   ;;  %s4991_s13 = smov 64  }
  0x62   : > { %3451 = dma.hbm_to_vmem [thread:$0]  (!%p4439_p5), %s4924_s3, 1024, %s305_s9, [#allocation7], %s4991_s13, %s4991_s13, %s4990_s1  }
  0x63   : > { %s4272_s30 = smov [#allocation9]   ;;  %s361_s10 = sand.u32 1, %s4231_s14  }
  0x64   : > { %s320_s6 = sshll.u32 %s4272_s30, 4  ;;  %s2622_s19 = sshll.u32 %s361_s10, 6  ;;  %s321_s6 = int_to_ptr.vmem [resolvable:$true] %s320_s6 }
  0x65   : > { %s4064_s25 = scalar_lea.vmem %s321_s6, 1024  ;;  %p4992_p4 = pmov %p4989_p7 }
  0x66   : > { %p4065_p13 = scmp.ne.s32.totalorder %s321_s6, %s4064_s25  ;;  %p4072_p8 = scmp.lt.s32.totalorder %s321_s6, %s321_s6 }
  0x67   : > { %p4073_p1 = scmp.lt.s32.totalorder %s4064_s25, %s4064_s25 }
  0x68   : > { %p4067_p6 = pnand %p4065_p13, %p4992_p4 }
  0x69   : > { %p4074_p7 = por %p4073_p1, %p4072_p8 }
  0x6a   : > { %p4068_p12 = pneg %p4067_p6 }
  0x6c   : > { %p4075_p3 = pnand %p4074_p7, %p4068_p12 }
  0x6e   : > { %4078 = shalt.err (!%p4075_p3)
}
  0x6f   : > { %3454 = dma.hbm_to_vmem [thread:$0]  (!%p4439_p5), %s4926_s5, 1024, %s321_s6, [#allocation10], %s4991_s13, %s4991_s13, %s4990_s1  }
  0x70   : > { %s2623_s12 = sshll.u32 %s4255_s20, 6  ;;  %s363_s28 = scalar_lea.vmem [#allocation11], %s2622_s19 }
  0x71   : > { %s368_s16 = scalar_lea.hbm %s4928_s7, %s2623_s12  ;;  %s369_s30 = sshll.u32 %s363_s28, 4  ;;  %s370_s30 = int_to_ptr.vmem [resolvable:$true] %s369_s30 }
  0x72   : > { %p4081_p2 = pneg %p4519_p11  ;;  %s4092_s24 = scalar_lea.vmem %s370_s30, 1024 }
  0x73   : > { %p4093_p10 = scmp.ne.s32.totalorder %s370_s30, %s4092_s24  ;;  %s4273_s10 = smov [#allocation11]  }
  0x74   : > { %s4097_s25 = sshll.u32 %s4273_s10, 4  ;;  %s4098_s25 = int_to_ptr.vmem [resolvable:$false] %s4097_s25 }
  0x75   : > { %p4095_p9 = pnand %p4093_p10, %p4081_p2  ;;  %s4099_s26 = scalar_lea.vmem %s4098_s25, 2048 }
  0x76   : > { %p4100_p4 = scmp.lt.s32.totalorder %s370_s30, %s4098_s25  ;;  %p4101_p5 = scmp.lt.s32.totalorder %s4099_s26, %s4092_s24 }
  0x77   : > { %p4096_p13 = pneg %p4095_p9 }
  0x78   : > { %p4102_p6 = por %p4101_p5, %p4100_p4 }
  0x7a   : > { %p4103_p12 = pnand %p4102_p6, %p4096_p13 }
  0x7c   : > { %4106 = shalt.err (!%p4103_p12)
}
  0x7d   : > { %s4274_s6 = smov 128   ;;  %387 = sbr.rel (%p4431_p0) target bundleno = 1288 (0x508), region = 56 }
  0x7e   : > { %3461 = dma.hbm_to_vmem [thread:$0]  (!%p4519_p11), %s368_s16, 1024, %s370_s30, %s4508_s4, %s4274_s6, %s4991_s13, %s4990_s1  }
  0x7f   : > { %s4993_s19 = sld [smem:[#allocation21_spill]] (!%p4431_p0)  ;;  %s389_s12 = sand.u32 (!%p4431_p0), 1, %s4396_s23  }
  0x80   : > { %s4994_s18 = sld [smem:[#allocation24_spill]] (!%p4431_p0)  ;;  %s390_s28 = scalar_lea.sflag (!%p4431_p0), [#allocation4], %s389_s12 }
  0x85   : > { %s391_s9 = sand.u32 1, %s4993_s19  }
  0x86   : > { %s2625_s15 = sshll.u32 %s391_s9, 9  ;;  %p4995_p8 = scmp.ne.s32.totalorder %s4994_s18, 0 }
  0x87   : > { %s4561_s24 = scalar_lea.vmem [#allocation3], %s2625_s15 }
  0x88   : > { %4190 = dma.done.wait (%p4995_p8), %s390_s28, 8192  }
  0x89   : > { %4192 = vsyncadd (%p4995_p8), %s390_s28, 4294959104  ;;  %p4996_p1 = scmp.eq.s32.totalorder %s4396_s23, 0 }
  0x8b   : > { %4194 = dma.done.wait (%p4996_p1), [#allocation7], 3072   ;;  %p4997_p11 = pmov %p4996_p1 }
  0x8c   : > { %p4998_p0 = pmov %p4996_p1 }
  0x8d   : > { %4196 = vsyncadd (%p4997_p11), [#allocation7], 4294964224 }
  0x8e   : > { %4198 = dma.done.wait (%p4998_p0), [#allocation10], 1024   ;;  %p4999_p7 = pmov %p4998_p0 }
  0x8f   : > { %s5000_s29 = sld [smem:[#allocation20_spill]] }
  0x90   : > { %4200 = vsyncadd (%p4999_p7), [#allocation10], 4294966272  ;;  %s5001_s4 = sld [smem:[#allocation25_spill]] }
  0x95   : > { %s412_s27 = sand.u32 1, %s5000_s29  }
  0x96   : > { %s2629_s1 = sshll.u32 %s412_s27, 6  ;;  %p5002_p3 = scmp.ne.s32.totalorder %s5001_s4, 0 }
  0x97   : > { %s4576_s13 = scalar_lea.vmem [#allocation11], %s2629_s1 }
  0x98   : > { %4202 = dma.done.wait (%p5002_p3), %s390_s28, 1024  }
  0x99   : > { %4204 = vsyncadd (%p5002_p3), %s390_s28, 4294966272  ;;  %s5003_s16 = sld [smem:[#allocation19_spill]] }
  0x9a   : > { %s5004_s30 = sld [smem:[#allocation22_spill]] }
  0x9b   : > { %s5005_s19 = sld [smem:[#allocation35_spill]] }
  0x9f   : > { %s454_s10 = sand.u32 1, %s5003_s16  }
  0xa0   : > { %p458_p2 = scmp.lt.s32.totalorder %s5004_s30, 1  ;;  %s2630_s23 = sshll.u32 %s454_s10, 7 }
  0xa1   : > { %s4593_s12 = scalar_lea.vmem [#allocation12], %s2630_s23  ;;  %p2631_p10 = scmp.ne.s32.totalorder %s5004_s30, 0 }
  0xa2   : > { %s4587_s25 = scalar_select %p458_p2, %s5004_s30, 1 }
  0xa3   : > { %466 = sbr.rel (%p2631_p10) target bundleno = 1013 (0x3f5), region = 80  ;;  %s5006_s28 = sld [smem:[#allocation32_spill]] (!%p2631_p10) }
  0xa4   : > { %s460_s18 = scalar_lea.vmem %s5005_s19, %s4587_s25  ;;  %s5007_s4 = sld [smem:[#allocation33_spill]] (!%p2631_p10) }
  0xa5   : > { %s5008_s16 = sld [smem:[#allocation34_spill]] (!%p2631_p10) }
  0xa8   : > { %v3597_v0 = vld [vmem:[#allocation6 + $0x78] sm:$0xff]   ;;  %v3599_v2 = vld [vmem:[#allocation6 + $0x70] sm:$0xff]   ;;  %v3601_v4 = vld [vmem:[#allocation6 + $0x68] sm:$0xff]  }
  0xa9   : > { %v3598_v1 = vld [vmem:[#allocation6 + $0x38] sm:$0xff]   ;;  %3083 = vmatprep.subr.bf16.mxu0 %v3597_v0  ;;  %v3600_v3 = vld [vmem:[#allocation6 + $0x30] sm:$0xff]   ;;  %v3602_v5 = vld [vmem:[#allocation6 + $0x28] sm:$0xff]  }
  0xaa   : > { %3084 = vmatpush3.bf16.msra.mxu0 %v3598_v1  ;;  %v3603_v6 = vld [vmem:[#allocation6 + $0x60] sm:$0xff]   ;;  %v3605_v8 = vld [vmem:[#allocation6 + $0x58] sm:$0xff]   ;;  %v3607_v10 = vld [vmem:[#allocation6 + $0x50] sm:$0xff]  }
  0xab   : > { %3085 = vmatprep.subr.bf16.mxu0 %v3599_v2  ;;  %v3604_v7 = vld [vmem:[#allocation6 + $0x20] sm:$0xff]   ;;  %v3606_v9 = vld [vmem:[#allocation6 + $0x18] sm:$0xff]   ;;  %v468_v11 = vld [vmem:[%s4561_s24 + $0x8] sm:$0xff] }
  0xac   : > { %v470_v12 = vld [vmem:[%s4561_s24 + $0x18] sm:$0xff]  ;;  %v3608_v14 = vld [vmem:[#allocation6 + $0x10] sm:$0xff]   ;;  %v3609_v15 = vld [vmem:[#allocation6 + $0x48] sm:$0xff]  }
  0xad   : > { %v532_v13 = vpack.c.bf16 %v470_v12, %v468_v11  ;;  %v3610_v16 = vld [vmem:[#allocation6 + $0x8] sm:$0xff]   ;;  %v3611_v17 = vld [vmem:[#allocation6 + $0x40] sm:$0xff]   ;;  %v469_v20 = vld [vmem:[%s4561_s24 + $0x10] sm:$0xff] }
  0xae   : > { %3086 = vmatpush3.bf16.msra.mxu0 %v3600_v3  ;;  %v3612_v18 = vld [vmem:[#allocation6] sm:$0xff]   ;;  %v472_v21 = vld [vmem:[%s4561_s24 + $0x28] sm:$0xff]  ;;  %v474_v22 = vld [vmem:[%s4561_s24 + $0x38] sm:$0xff] }
  0xaf   : > { %3087 = vmatprep.subr.bf16.mxu0 %v3601_v4  ;;  %730 = vmatprep.mubr.bf16.mxu0 %v532_v13  ;;  %v467_v19 = vld [vmem:[%s4561_s24] sm:$0xff]  ;;  %v534_v24 = vpack.c.bf16 %v474_v22, %v472_v21  ;;  %v473_v26 = vld [vmem:[%s4561_s24 + $0x30] sm:$0xff]  ;;  %v476_v27 = vld [vmem:[%s4561_s24 + $0x48] sm:$0xff] }
  0xb0   : > { %v531_v23 = vpack.c.bf16 %v469_v20, %v467_v19  ;;  %v471_v25 = vld [vmem:[%s4561_s24 + $0x20] sm:$0xff]  ;;  %v478_v28 = vld [vmem:[%s4561_s24 + $0x58] sm:$0xff]  ;;  %v477_v32 = vld [vmem:[%s4561_s24 + $0x50] sm:$0xff] }
  0xb1   : > { %v533_v29 = vpack.c.bf16 %v473_v26, %v471_v25  ;;  %v536_v30 = vpack.c.bf16 %v478_v28, %v476_v27  ;;  %v475_v31 = vld [vmem:[%s4561_s24 + $0x40] sm:$0xff]  ;;  %v480_v33 = vld [vmem:[%s4561_s24 + $0x68] sm:$0xff]  ;;  %v482_v34 = vld [vmem:[%s4561_s24 + $0x78] sm:$0xff] }
  0xb2   : > { %3088 = vmatpush3.bf16.msra.mxu0 %v3602_v5  ;;  %v535_v35 = vpack.c.bf16 %v477_v32, %v475_v31  ;;  %v538_v36 = vpack.c.bf16 %v482_v34, %v480_v33  ;;  %v479_v37 = vld [vmem:[%s4561_s24 + $0x60] sm:$0xff]  ;;  %v481_v38 = vld [vmem:[%s4561_s24 + $0x70] sm:$0xff]  ;;  %v484_v39 = vld [vmem:[%s4561_s24 + $0x88] sm:$0xff] }
  0xb3   : > { %3089 = vmatprep.subr.bf16.mxu0 %v3603_v6  ;;  %v486_v40 = vld [vmem:[%s4561_s24 + $0x98] sm:$0xff]  ;;  %v537_v41 = vpack.c.bf16 %v481_v38, %v479_v37  ;;  %v483_v43 = vld [vmem:[%s4561_s24 + $0x80] sm:$0xff]  ;;  %v485_v44 = vld [vmem:[%s4561_s24 + $0x90] sm:$0xff] }
  0xb4   : > { %v540_v42 = vpack.c.bf16 %v486_v40, %v484_v39  ;;  %v488_v45 = vld [vmem:[%s4561_s24 + $0xa8] sm:$0xff]  ;;  %v490_v46 = vld [vmem:[%s4561_s24 + $0xb8] sm:$0xff]  ;;  %v539_v47 = vpack.c.bf16 %v485_v44, %v483_v43  ;;  %v487_v49 = vld [vmem:[%s4561_s24 + $0xa0] sm:$0xff] }
  0xb5   : > { %v542_v48 = vpack.c.bf16 %v490_v46, %v488_v45  ;;  %v489_v50 = vld [vmem:[%s4561_s24 + $0xb0] sm:$0xff]  ;;  %v492_v51 = vld [vmem:[%s4561_s24 + $0xc8] sm:$0xff]  ;;  %v494_v52 = vld [vmem:[%s4561_s24 + $0xd8] sm:$0xff] }
  0xb6   : > { %3090 = vmatpush3.bf16.msra.mxu0 %v3604_v7  ;;  %v541_v53 = vpack.c.bf16 %v489_v50, %v487_v49  ;;  %v544_v54 = vpack.c.bf16 %v494_v52, %v492_v51  ;;  %v491_v55 = vld [vmem:[%s4561_s24 + $0xc0] sm:$0xff]  ;;  %v493_v56 = vld [vmem:[%s4561_s24 + $0xd0] sm:$0xff]  ;;  %v496_v57 = vld [vmem:[%s4561_s24 + $0xe8] sm:$0xff] }
  0xb7   : > { %3091 = vmatprep.subr.bf16.mxu0 %v3605_v8  ;;  %v498_v58 = vld [vmem:[%s4561_s24 + $0xf8] sm:$0xff]  ;;  %v543_v59 = vpack.c.bf16 %v493_v56, %v491_v55  ;;  %v495_v61 = vld [vmem:[%s4561_s24 + $0xe0] sm:$0xff]  ;;  %v497_v62 = vld [vmem:[%s4561_s24 + $0xf0] sm:$0xff] }
  0xb8   : > { %v546_v60 = vpack.c.bf16 %v498_v58, %v496_v57  ;;  %v500_v63 = vld [vmem:[%s4561_s24 + $0x108] sm:$0xff]  ;;  %v502_v0 = vld [vmem:[%s4561_s24 + $0x118] sm:$0xff]  ;;  %v545_v1 = vpack.c.bf16 %v497_v62, %v495_v61  ;;  %v499_v3 = vld [vmem:[%s4561_s24 + $0x100] sm:$0xff] }
  0xb9   : > { %v548_v2 = vpack.c.bf16 %v502_v0, %v500_v63  ;;  %v501_v4 = vld [vmem:[%s4561_s24 + $0x110] sm:$0xff]  ;;  %v504_v5 = vld [vmem:[%s4561_s24 + $0x128] sm:$0xff]  ;;  %v506_v6 = vld [vmem:[%s4561_s24 + $0x138] sm:$0xff] }
  0xba   : > { %3092 = vmatpush3.bf16.msra.mxu0 %v3606_v9  ;;  %v547_v7 = vpack.c.bf16 %v501_v4, %v499_v3  ;;  %v550_v8 = vpack.c.bf16 %v506_v6, %v504_v5  ;;  %v503_v9 = vld [vmem:[%s4561_s24 + $0x120] sm:$0xff]  ;;  %v508_v11 = vld [vmem:[%s4561_s24 + $0x148] sm:$0xff]  ;;  %v510_v12 = vld [vmem:[%s4561_s24 + $0x158] sm:$0xff] }
  0xbb   : > { %3093 = vmatprep.subr.bf16.mxu0 %v3607_v10  ;;  %v505_v10 = vld [vmem:[%s4561_s24 + $0x130] sm:$0xff]  ;;  %v511_v21 = vld [vmem:[%s4561_s24 + $0x160] sm:$0xff]  ;;  %v3613_v26 = vld [vmem:[#allocation8 + $0x38] sm:$0xff]  }
  0xbc   : > { %v549_v13 = vpack.c.bf16 %v505_v10, %v503_v9  ;;  %v513_v22 = vld [vmem:[%s4561_s24 + $0x170] sm:$0xff]  ;;  %3267 = vmatprep.subr.bf16.mxu1 %v3613_v26  ;;  %v520_v31 = vld [vmem:[%s4561_s24 + $0x1a8] sm:$0xff]  ;;  %v522_v32 = vld [vmem:[%s4561_s24 + $0x1b8] sm:$0xff] }
  0xbd   : > { %v553_v25 = vpack.c.bf16 %v513_v22, %v511_v21  ;;  %3268 = vmatpush3.bf16.msra.mxu1 %v3613_v26  ;;  %v3614_v28 = vld [vmem:[#allocation8 + $0x30] sm:$0xff]   ;;  %v3615_v34 = vld [vmem:[#allocation8 + $0x28] sm:$0xff]   ;;  %v519_v37 = vld [vmem:[%s4561_s24 + $0x1a0] sm:$0xff] }
  0xbe   : > { %3094 = vmatpush3.bf16.msra.mxu0 %v3608_v14  ;;  %v552_v14 = vpack.c.bf16 %v510_v12, %v508_v11  ;;  %3269 = vmatprep.subr.bf16.mxu1 %v3614_v28  ;;  %v521_v38 = vld [vmem:[%s4561_s24 + $0x1b0] sm:$0xff]  ;;  %v524_v39 = vld [vmem:[%s4561_s24 + $0x1c8] sm:$0xff]  ;;  %v526_v40 = vld [vmem:[%s4561_s24 + $0x1d8] sm:$0xff] }
  0xbf   : > { %3095 = vmatprep.subr.bf16.mxu0 %v3609_v15  ;;  %v507_v15 = vld [vmem:[%s4561_s24 + $0x140] sm:$0xff]  ;;  %v560_v43 = vpack.c.bf16 %v526_v40, %v524_v39  ;;  %v3618_v44 = vld [vmem:[#allocation8 + $0x10] sm:$0xff]   ;;  %v3619_v50 = vld [vmem:[#allocation8 + $0x8] sm:$0xff]  }
  0xc0   : > { %v523_v45 = vld [vmem:[%s4561_s24 + $0x1c0] sm:$0xff]  ;;  %v525_v46 = vld [vmem:[%s4561_s24 + $0x1d0] sm:$0xff] }
  0xc1   : > { %3270 = vmatpush3.bf16.msra.mxu1 %v3614_v28  ;;  %v559_v49 = vpack.c.bf16 %v525_v46, %v523_v45  ;;  %v3620_v52 = vld [vmem:[#allocation8] sm:$0xff]  }
  0xc2   : > { %3096 = vmatpush3.bf16.msra.mxu0 %v3610_v16  ;;  %v509_v16 = vld [vmem:[%s4561_s24 + $0x150] sm:$0xff]  ;;  %3271 = vmatprep.subr.bf16.mxu1 %v3615_v34  ;;  %v4663_v57 = vld [vmem:[%s5006_s28] ss:$0 sm:$0xff] }
  0xc3   : > { %3097 = vmatprep.subr.bf16.mxu0 %v3611_v17  ;;  %v512_v17 = vld [vmem:[%s4561_s24 + $0x168] sm:$0xff]  ;;  %v551_v19 = vpack.c.bf16 %v509_v16, %v507_v15 }
  0xc5   : > { %3272 = vmatpush3.bf16.msra.mxu1 %v3615_v34 }
  0xc6   : > { %3098 = vmatpush3.bf16.msra.mxu0 %v3612_v18  ;;  %v514_v18 = vld [vmem:[%s4561_s24 + $0x178] sm:$0xff] }
  0xc7   : > { %v554_v20 = vpack.c.bf16 %v514_v18, %v512_v17 }
  0xc9   : > { %731 = vmatmul.mubr.bf16.vlgmr.msra.gmra.mxu0 %v531_v23  ;;  %v516_v23 = vld [vmem:[%s4561_s24 + $0x188] sm:$0xff] }
  0xca   : > { %738 = vmatprep.mubr.bf16.mxu0 %v534_v24  ;;  %v518_v24 = vld [vmem:[%s4561_s24 + $0x198] sm:$0xff] }
  0xcb   : > { %v556_v27 = vpack.c.bf16 %v518_v24, %v516_v23 }
  0xd1   : > { %739 = vmatmul.mubr.bf16.gmra.mxu0 %v533_v29  ;;  %v515_v29 = vld [vmem:[%s4561_s24 + $0x180] sm:$0xff] }
  0xd2   : > { %746 = vmatprep.mubr.bf16.mxu0 %v536_v30  ;;  %v517_v30 = vld [vmem:[%s4561_s24 + $0x190] sm:$0xff] }
  0xd3   : > { %v555_v33 = vpack.c.bf16 %v517_v30, %v515_v29 }
  0xd9   : > { %747 = vmatmul.mubr.bf16.gmra.mxu0 %v535_v35  ;;  %v558_v35 = vpack.c.bf16 %v522_v32, %v520_v31 }
  0xda   : > { %754 = vmatprep.mubr.bf16.mxu0 %v538_v36  ;;  %v3616_v36 = vld [vmem:[#allocation8 + $0x20] sm:$0xff]  }
  0xdb   : > { %3273 = vmatprep.subr.bf16.mxu1 %v3616_v36 }
  0xdc   : > { %3274 = vmatpush3.bf16.msra.mxu1 %v3616_v36 }
  0xe1   : > { %755 = vmatmul.mubr.bf16.gmra.mxu0 %v537_v41  ;;  %v557_v41 = vpack.c.bf16 %v521_v38, %v519_v37 }
  0xe2   : > { %762 = vmatprep.mubr.bf16.mxu0 %v540_v42  ;;  %v3617_v42 = vld [vmem:[#allocation8 + $0x18] sm:$0xff]  }
  0xe3   : > { %3275 = vmatprep.subr.bf16.mxu1 %v3617_v42 }
  0xe4   : > { %3276 = vmatpush3.bf16.msra.mxu1 %v3617_v42 }
  0xe5   : > { %3277 = vmatprep.subr.bf16.mxu1 %v3618_v44 }
  0xe8   : > { %3278 = vmatpush3.bf16.msra.mxu1 %v3618_v44 }
  0xe9   : > { %763 = vmatmul.mubr.bf16.gmra.mxu0 %v539_v47  ;;  %v528_v47 = vld [vmem:[%s4561_s24 + $0x1e8] sm:$0xff]  ;;  %3279 = vmatprep.subr.bf16.mxu1 %v3619_v50 }
  0xea   : > { %770 = vmatprep.mubr.bf16.mxu0 %v542_v48  ;;  %v530_v48 = vld [vmem:[%s4561_s24 + $0x1f8] sm:$0xff] }
  0xeb   : > { %v562_v51 = vpack.c.bf16 %v530_v48, %v528_v47  ;;  %v3621_v47 = vld [vmem:[#allocation9 + $0x38] sm:$0xff]  }
  0xec   : > { %3280 = vmatpush3.bf16.msra.mxu1 %v3619_v50 }
  0xed   : > { %3281 = vmatprep.subr.bf16.mxu1 %v3620_v52 }
  0xf0   : > { %3282 = vmatpush3.bf16.msra.mxu1 %v3620_v52 }
  0xf1   : > { %771 = vmatmul.mubr.bf16.gmra.mxu0 %v541_v53  ;;  %v527_v53 = vld [vmem:[%s4561_s24 + $0x1e0] sm:$0xff]  ;;  %3315 = vmatprep.subr.bf16.mxu1 %v3621_v47 }
  0xf2   : > { %778 = vmatprep.mubr.bf16.mxu0 %v544_v54  ;;  %v529_v54 = vld [vmem:[%s4561_s24 + $0x1f0] sm:$0xff] }
  0xf3   : > { %v561_v55 = vpack.c.bf16 %v529_v54, %v527_v53 }
  0xf9   : > { %779 = vmatmul.mubr.bf16.gmra.mxu0 %v543_v59 }
  0xfa   : > { %786 = vmatprep.mubr.bf16.mxu0 %v546_v60 }
 0x101   : > { %787 = vmatmul.mubr.bf16.gmra.mxu0 %v545_v1 }
 0x102   : > { %794 = vmatprep.mubr.bf16.mxu0 %v548_v2 }
 0x109   : > { %795 = vmatmul.mubr.bf16.gmra.mxu0 %v547_v7 }
 0x10a   : > { %802 = vmatprep.mubr.bf16.mxu0 %v550_v8 }
 0x111   : > { %803 = vmatmul.mubr.bf16.gmra.mxu0 %v549_v13 }
 0x112   : > { %810 = vmatprep.mubr.bf16.mxu0 %v552_v14 }
 0x119   : > { %811 = vmatmul.mubr.bf16.gmra.mxu0 %v551_v19 }
 0x11a   : > { %818 = vmatprep.mubr.bf16.mxu0 %v554_v20 }
 0x121   : > { %819 = vmatmul.mubr.bf16.gmra.mxu0 %v553_v25 }
 0x122   : > { %826 = vmatprep.mubr.bf16.mxu0 %v556_v27 }
 0x129   : > { %827 = vmatmul.mubr.bf16.gmra.mxu0 %v555_v33 }
 0x12a   : > { %834 = vmatprep.mubr.bf16.mxu0 %v558_v35 }
 0x131   : > { %835 = vmatmul.mubr.bf16.gmra.mxu0 %v557_v41 }
 0x132   : > { %842 = vmatprep.mubr.bf16.mxu0 %v560_v43 }
 0x139   : > { %843 = vmatmul.mubr.bf16.gmra.mxu0 %v559_v49 }
 0x13a   : > { %850 = vmatprep.mubr.bf16.mxu0 %v562_v51 }
 0x141   : > { %851 = vmatmul.mubr.bf16.gmra.mxu0 %v561_v55 }
 0x189   : > { %v3099_v56 = vpop.f32.mrf.mxu0 }
 0x18b   : > { %v3100_v58 = vpop.f32.mrf.mxu0 }
 0x18c   : > { %v3101_v59 = vadd.f32 %v3100_v58, %v3099_v56 }
 0x18d   : > { %v3102_v60 = vpop.f32.mrf.mxu0 }
 0x18e   : > { %v733_v61 = vadd.f32 %v3101_v59, %v4663_v57 }
 0x18f   : > { %v3103_v62 = vpop.f32.mrf.mxu0 }
 0x190   : > { %v2649_v63 = vmul.f32 -1.442695, %v733_v61  ;;  %v3104_v0 = vadd.f32 %v3103_v62, %v3102_v60 }
 0x191   : > { %v3105_v1 = vpop.f32.mrf.mxu0 }
 0x192   : > { %3629 = vpow2.f32 %v2649_v63  ;;  %v736_v2 = vadd.f32 %v3104_v0, %v4663_v57 }
 0x193   : > { %v3106_v3 = vpop.f32.mrf.mxu0 }
 0x194   : > { %v2650_v4 = vmul.f32 -1.442695, %v736_v2  ;;  %v3107_v5 = vadd.f32 %v3106_v3, %v3105_v1 }
 0x195   : > { %v3108_v6 = vpop.f32.mrf.mxu0 }
 0x196   : > { %3631 = vpow2.f32 %v2650_v4  ;;  %v741_v7 = vadd.f32 %v3107_v5, %v4663_v57 }
 0x197   : > { %v3109_v8 = vpop.f32.mrf.mxu0 }
 0x198   : > { %v2651_v9 = vmul.f32 -1.442695, %v741_v7  ;;  %v3110_v10 = vadd.f32 %v3109_v8, %v3108_v6 }
 0x199   : > { %v3111_v11 = vpop.f32.mrf.mxu0 }
 0x19a   : > { %3633 = vpow2.f32 %v2651_v9  ;;  %v744_v12 = vadd.f32 %v3110_v10, %v4663_v57 }
 0x19b   : > { %v3112_v13 = vpop.f32.mrf.mxu0 }
 0x19c   : > { %v2652_v14 = vmul.f32 -1.442695, %v744_v12  ;;  %v3113_v15 = vadd.f32 %v3112_v13, %v3111_v11 }
 0x19d   : > { %v3114_v16 = vpop.f32.mrf.mxu0 }
 0x19e   : > { %3635 = vpow2.f32 %v2652_v14  ;;  %v749_v17 = vadd.f32 %v3113_v15, %v4663_v57  ;;  %v3622_v15 = vld [vmem:[#allocation9 + $0x30] sm:$0xff]  }
 0x19f   : > { %v3630_v18 = vpop.eup %3629  ;;  %v3115_v19 = vpop.f32.mrf.mxu0 }
 0x1a0   : > { %v2653_v20 = vmul.f32 -1.442695, %v749_v17  ;;  %v3116_v21 = vadd.f32 %v3115_v19, %v3114_v16  ;;  %v955_v22 = vadd.f32 1.0, %v3630_v18 }
 0x1a1   : > { %v3117_v23 = vpop.f32.mrf.mxu0 }
 0x1a2   : > { %v752_v24 = vadd.f32 %v3116_v21, %v4663_v57  ;;  %3637 = vpow2.f32 %v2653_v20 }
 0x1a3   : > { %v3632_v25 = vpop.eup %3631  ;;  %v3118_v26 = vpop.f32.mrf.mxu0  ;;  %3639 = vrcp.f32 %v955_v22 }
 0x1a4   : > { %v956_v27 = vadd.f32 1.0, %v3632_v25  ;;  %v2654_v28 = vmul.f32 -1.442695, %v752_v24  ;;  %v3119_v29 = vadd.f32 %v3118_v26, %v3117_v23 }
 0x1a5   : > { %v3120_v30 = vpop.f32.mrf.mxu0 }
 0x1a6   : > { %3641 = vrcp.f32 %v956_v27  ;;  %v757_v31 = vadd.f32 %v3119_v29, %v4663_v57 }
 0x1a7   : > { %v3634_v32 = vpop.eup %3633  ;;  %3643 = vpow2.f32 %v2654_v28  ;;  %v3121_v33 = vpop.f32.mrf.mxu0 }
 0x1a8   : > { %v2655_v34 = vmul.f32 -1.442695, %v757_v31  ;;  %v3122_v35 = vadd.f32 %v3121_v33, %v3120_v30  ;;  %v957_v36 = vadd.f32 1.0, %v3634_v32 }
 0x1a9   : > { %v3123_v37 = vpop.f32.mrf.mxu0 }
 0x1aa   : > { %v760_v38 = vadd.f32 %v3122_v35, %v4663_v57  ;;  %3645 = vpow2.f32 %v2655_v34 }
 0x1ab   : > { %v3636_v39 = vpop.eup %3635  ;;  %v3124_v40 = vpop.f32.mrf.mxu0  ;;  %3647 = vrcp.f32 %v957_v36 }
 0x1ac   : > { %v958_v41 = vadd.f32 1.0, %v3636_v39  ;;  %v2656_v42 = vmul.f32 -1.442695, %v760_v38  ;;  %v3125_v43 = vadd.f32 %v3124_v40, %v3123_v37 }
 0x1ad   : > { %v3126_v44 = vpop.f32.mrf.mxu0 }
 0x1ae   : > { %3649 = vrcp.f32 %v958_v41  ;;  %v765_v45 = vadd.f32 %v3125_v43, %v4663_v57 }
 0x1af   : > { %3651 = vpow2.f32 %v2656_v42  ;;  %v3127_v46 = vpop.f32.mrf.mxu0  ;;  %v3638_v48 = vpop.eup %3637 }
 0x1b0   : > { %v2657_v49 = vmul.f32 -1.442695, %v765_v45  ;;  %v3128_v50 = vadd.f32 %v3127_v46, %v3126_v44  ;;  %v959_v51 = vadd.f32 1.0, %v3638_v48  ;;  %v3640_v53 = vpop.eup %3639 }
 0x1b1   : > { %v3129_v52 = vpop.f32.mrf.mxu0 }
 0x1b2   : > { %3653 = vpow2.f32 %v2657_v49  ;;  %v768_v54 = vadd.f32 %v3128_v50, %v4663_v57 }
 0x1b3   : > { %v3642_v55 = vpop.eup %3641  ;;  %v3130_v56 = vpop.f32.mrf.mxu0  ;;  %3655 = vrcp.f32 %v959_v51 }
 0x1b4   : > { %v3644_v58 = vpop.eup %3643  ;;  %v2658_v59 = vmul.f32 -1.442695, %v768_v54  ;;  %v3131_v60 = vadd.f32 %v3130_v56, %v3129_v52  ;;  %v1051_v61 = vpack.c.bf16 %v3642_v55, %v3640_v53 }
 0x1b5   : > { %v960_v62 = vadd.f32 1.0, %v3644_v58  ;;  %v3132_v63 = vpop.f32.mrf.mxu0 }
 0x1b6   : > { %3657 = vpow2.f32 %v2658_v59  ;;  %v773_v0 = vadd.f32 %v3131_v60, %v4663_v57  ;;  %3283 = vmatprep.mubr.bf16.mxu1 %v1051_v61 }
 0x1b7   : > { %3659 = vrcp.f32 %v960_v62  ;;  %v3133_v1 = vpop.f32.mrf.mxu0  ;;  %v3646_v2 = vpop.eup %3645 }
 0x1b8   : > { %v2659_v3 = vmul.f32 -1.442695, %v773_v0  ;;  %v3134_v4 = vadd.f32 %v3133_v1, %v3132_v63  ;;  %v961_v5 = vadd.f32 1.0, %v3646_v2  ;;  %v3648_v7 = vpop.eup %3647 }
 0x1b9   : > { %v3135_v6 = vpop.f32.mrf.mxu0 }
 0x1ba   : > { %3661 = vpow2.f32 %v2659_v3  ;;  %v776_v8 = vadd.f32 %v3134_v4, %v4663_v57 }
 0x1bb   : > { %v3650_v9 = vpop.eup %3649  ;;  %v3136_v10 = vpop.f32.mrf.mxu0  ;;  %3663 = vrcp.f32 %v961_v5 }
 0x1bc   : > { %v3652_v11 = vpop.eup %3651  ;;  %v2660_v12 = vmul.f32 -1.442695, %v776_v8  ;;  %v3137_v13 = vadd.f32 %v3136_v10, %v3135_v6  ;;  %v1052_v14 = vpack.c.bf16 %v3650_v9, %v3648_v7 }
 0x1bd   : > { %v962_v16 = vadd.f32 1.0, %v3652_v11  ;;  %v3138_v17 = vpop.f32.mrf.mxu0 }
 0x1be   : > { %3665 = vpow2.f32 %v2660_v12  ;;  %v781_v18 = vadd.f32 %v3137_v13, %v4663_v57  ;;  %3284 = vmatmul.mubr.bf16.vlgmr.msra.gmra.mxu1 %v1052_v14 }
 0x1bf   : > { %v3654_v19 = vpop.eup %3653  ;;  %3667 = vrcp.f32 %v962_v16  ;;  %v3139_v20 = vpop.f32.mrf.mxu0  ;;  %3316 = vmatpush3.bf16.msra.mxu1 %v3621_v47 }
 0x1c0   : > { %v2661_v21 = vmul.f32 -1.442695, %v781_v18  ;;  %v3140_v22 = vadd.f32 %v3139_v20, %v3138_v17  ;;  %3317 = vmatprep.subr.bf16.mxu1 %v3622_v15  ;;  %v963_v23 = vadd.f32 1.0, %v3654_v19  ;;  %v3656_v25 = vpop.eup %3655 }
 0x1c1   : > { %v3141_v24 = vpop.f32.mrf.mxu0 }
 0x1c2   : > { %v784_v26 = vadd.f32 %v3140_v22, %v4663_v57  ;;  %3669 = vpow2.f32 %v2661_v21 }
 0x1c3   : > { %v3658_v27 = vpop.eup %3657  ;;  %v3142_v28 = vpop.f32.mrf.mxu0  ;;  %3318 = vmatpush3.bf16.msra.mxu1 %v3622_v15  ;;  %3671 = vrcp.f32 %v963_v23 }
 0x1c4   : > { %v3660_v29 = vpop.eup %3659  ;;  %v964_v30 = vadd.f32 1.0, %v3658_v27  ;;  %v2662_v31 = vmul.f32 -1.442695, %v784_v26  ;;  %v3143_v32 = vadd.f32 %v3142_v28, %v3141_v24 }
 0x1c5   : > { %v3144_v33 = vpop.f32.mrf.mxu0  ;;  %v1053_v34 = vpack.c.bf16 %v3660_v29, %v3656_v25 }
 0x1c6   : > { %3673 = vrcp.f32 %v964_v30  ;;  %v789_v35 = vadd.f32 %v3143_v32, %v4663_v57 }
 0x1c7   : > { %v3662_v36 = vpop.eup %3661  ;;  %3675 = vpow2.f32 %v2662_v31  ;;  %3287 = vmatprep.mubr.bf16.mxu1 %v1053_v34  ;;  %v3145_v37 = vpop.f32.mrf.mxu0 }
 0x1c8   : > { %v2663_v38 = vmul.f32 -1.442695, %v789_v35  ;;  %v3146_v39 = vadd.f32 %v3145_v37, %v3144_v33  ;;  %v965_v40 = vadd.f32 1.0, %v3662_v36  ;;  %v3664_v42 = vpop.eup %3663 }
 0x1c9   : > { %v3147_v41 = vpop.f32.mrf.mxu0 }
 0x1ca   : > { %v792_v43 = vadd.f32 %v3146_v39, %v4663_v57  ;;  %3677 = vpow2.f32 %v2663_v38 }
 0x1cb   : > { %v3666_v44 = vpop.eup %3665  ;;  %v3148_v45 = vpop.f32.mrf.mxu0  ;;  %3679 = vrcp.f32 %v965_v40 }
 0x1cc   : > { %v3668_v46 = vpop.eup %3667  ;;  %v966_v47 = vadd.f32 1.0, %v3666_v44  ;;  %v2664_v48 = vmul.f32 -1.442695, %v792_v43  ;;  %v3149_v49 = vadd.f32 %v3148_v45, %v3147_v41 }
 0x1cd   : > { %v3150_v50 = vpop.f32.mrf.mxu0  ;;  %v1054_v51 = vpack.c.bf16 %v3668_v46, %v3664_v42 }
 0x1ce   : > { %3681 = vrcp.f32 %v966_v47  ;;  %v797_v52 = vadd.f32 %v3149_v49, %v4663_v57 }
 0x1cf   : > { %3683 = vpow2.f32 %v2664_v48  ;;  %3288 = vmatmul.mubr.bf16.gmra.mxu1 %v1054_v51  ;;  %v3151_v53 = vpop.f32.mrf.mxu0  ;;  %v3670_v54 = vpop.eup %3669 }
 0x1d0   : > { %v2665_v55 = vmul.f32 -1.442695, %v797_v52  ;;  %v3152_v56 = vadd.f32 %v3151_v53, %v3150_v50  ;;  %v967_v58 = vadd.f32 1.0, %v3670_v54  ;;  %v3672_v60 = vpop.eup %3671 }
 0x1d1   : > { %v3153_v59 = vpop.f32.mrf.mxu0 }
 0x1d2   : > { %3685 = vpow2.f32 %v2665_v55  ;;  %v800_v61 = vadd.f32 %v3152_v56, %v4663_v57 }
 0x1d3   : > { %v3674_v62 = vpop.eup %3673  ;;  %v3154_v63 = vpop.f32.mrf.mxu0  ;;  %3687 = vrcp.f32 %v967_v58 }
 0x1d4   : > { %v3676_v0 = vpop.eup %3675  ;;  %v2666_v1 = vmul.f32 -1.442695, %v800_v61  ;;  %v3155_v2 = vadd.f32 %v3154_v63, %v3153_v59  ;;  %v1055_v3 = vpack.c.bf16 %v3674_v62, %v3672_v60 }
 0x1d5   : > { %v968_v4 = vadd.f32 1.0, %v3676_v0  ;;  %v3156_v5 = vpop.f32.mrf.mxu0 }
 0x1d6   : > { %3689 = vpow2.f32 %v2666_v1  ;;  %v805_v6 = vadd.f32 %v3155_v2, %v4663_v57  ;;  %3291 = vmatprep.mubr.bf16.mxu1 %v1055_v3 }
 0x1d7   : > { %3691 = vrcp.f32 %v968_v4  ;;  %v3157_v7 = vpop.f32.mrf.mxu0  ;;  %v3678_v8 = vpop.eup %3677 }
 0x1d8   : > { %v2667_v9 = vmul.f32 -1.442695, %v805_v6  ;;  %v3158_v10 = vadd.f32 %v3157_v7, %v3156_v5  ;;  %v969_v11 = vadd.f32 1.0, %v3678_v8  ;;  %v3680_v13 = vpop.eup %3679 }
 0x1d9   : > { %v3159_v12 = vpop.f32.mrf.mxu0 }
 0x1da   : > { %3693 = vpow2.f32 %v2667_v9  ;;  %v808_v14 = vadd.f32 %v3158_v10, %v4663_v57 }
 0x1db   : > { %v3682_v15 = vpop.eup %3681  ;;  %v3160_v16 = vpop.f32.mrf.mxu0  ;;  %3695 = vrcp.f32 %v969_v11 }
 0x1dc   : > { %v3684_v17 = vpop.eup %3683  ;;  %v2668_v18 = vmul.f32 -1.442695, %v808_v14  ;;  %v3161_v19 = vadd.f32 %v3160_v16, %v3159_v12  ;;  %v1056_v20 = vpack.c.bf16 %v3682_v15, %v3680_v13 }
 0x1dd   : > { %v970_v21 = vadd.f32 1.0, %v3684_v17  ;;  %v3162_v22 = vpop.f32.mrf.mxu0 }
 0x1de   : > { %3697 = vpow2.f32 %v2668_v18  ;;  %v813_v23 = vadd.f32 %v3161_v19, %v4663_v57  ;;  %3292 = vmatmul.mubr.bf16.gmra.mxu1 %v1056_v20 }
 0x1df   : > { %v3686_v24 = vpop.eup %3685  ;;  %3699 = vrcp.f32 %v970_v21  ;;  %v3163_v25 = vpop.f32.mrf.mxu0 }
 0x1e0   : > { %v2669_v26 = vmul.f32 -1.442695, %v813_v23  ;;  %v3164_v27 = vadd.f32 %v3163_v25, %v3162_v22  ;;  %v971_v28 = vadd.f32 1.0, %v3686_v24  ;;  %v3688_v30 = vpop.eup %3687 }
 0x1e1   : > { %v3165_v29 = vpop.f32.mrf.mxu0 }
 0x1e2   : > { %v816_v31 = vadd.f32 %v3164_v27, %v4663_v57  ;;  %3701 = vpow2.f32 %v2669_v26 }
 0x1e3   : > { %v3690_v32 = vpop.eup %3689  ;;  %v3166_v33 = vpop.f32.mrf.mxu0  ;;  %3703 = vrcp.f32 %v971_v28 }
 0x1e4   : > { %v3692_v34 = vpop.eup %3691  ;;  %v972_v35 = vadd.f32 1.0, %v3690_v32  ;;  %v2670_v36 = vmul.f32 -1.442695, %v816_v31  ;;  %v3167_v37 = vadd.f32 %v3166_v33, %v3165_v29  ;;  %v3623_v31 = vld [vmem:[#allocation9 + $0x28] sm:$0xff]  }
 0x1e5   : > { %v3168_v38 = vpop.f32.mrf.mxu0  ;;  %v1057_v39 = vpack.c.bf16 %v3692_v34, %v3688_v30  ;;  %3319 = vmatprep.subr.bf16.mxu1 %v3623_v31 }
 0x1e6   : > { %3705 = vrcp.f32 %v972_v35  ;;  %v821_v40 = vadd.f32 %v3167_v37, %v4663_v57  ;;  %3320 = vmatpush3.bf16.msra.mxu1 %v3623_v31 }
 0x1e7   : > { %v3694_v41 = vpop.eup %3693  ;;  %3707 = vpow2.f32 %v2670_v36  ;;  %3295 = vmatprep.mubr.bf16.mxu1 %v1057_v39  ;;  %v3169_v42 = vpop.f32.mrf.mxu0 }
 0x1e8   : > { %v2671_v43 = vmul.f32 -1.442695, %v821_v40  ;;  %v3170_v44 = vadd.f32 %v3169_v42, %v3168_v38  ;;  %v973_v45 = vadd.f32 1.0, %v3694_v41  ;;  %v3696_v47 = vpop.eup %3695  ;;  %v3624_v40 = vld [vmem:[#allocation9 + $0x20] sm:$0xff]  }
 0x1e9   : > { %v3171_v46 = vpop.f32.mrf.mxu0  ;;  %3321 = vmatprep.subr.bf16.mxu1 %v3624_v40 }
 0x1ea   : > { %v824_v48 = vadd.f32 %v3170_v44, %v4663_v57  ;;  %3709 = vpow2.f32 %v2671_v43  ;;  %3322 = vmatpush3.bf16.msra.mxu1 %v3624_v40 }
 0x1eb   : > { %v3698_v49 = vpop.eup %3697  ;;  %v3172_v50 = vpop.f32.mrf.mxu0  ;;  %3711 = vrcp.f32 %v973_v45 }
 0x1ec   : > { %v3700_v51 = vpop.eup %3699  ;;  %v974_v52 = vadd.f32 1.0, %v3698_v49  ;;  %v2672_v53 = vmul.f32 -1.442695, %v824_v48  ;;  %v3173_v54 = vadd.f32 %v3172_v50, %v3171_v46  ;;  %v3625_v50 = vld [vmem:[#allocation9 + $0x18] sm:$0xff]  }
 0x1ed   : > { %v3174_v55 = vpop.f32.mrf.mxu0  ;;  %v1058_v56 = vpack.c.bf16 %v3700_v51, %v3696_v47  ;;  %v3626_v51 = vld [vmem:[#allocation9 + $0x10] sm:$0xff]   ;;  %3323 = vmatprep.subr.bf16.mxu1 %v3625_v50 }
 0x1ee   : > { %3713 = vrcp.f32 %v974_v52  ;;  %v829_v58 = vadd.f32 %v3173_v54, %v4663_v57  ;;  %3324 = vmatpush3.bf16.msra.mxu1 %v3625_v50 }
 0x1ef   : > { %3715 = vpow2.f32 %v2672_v53  ;;  %3296 = vmatmul.mubr.bf16.gmra.mxu1 %v1058_v56  ;;  %v3175_v59 = vpop.f32.mrf.mxu0  ;;  %v3702_v60 = vpop.eup %3701  ;;  %3325 = vmatprep.subr.bf16.mxu1 %v3626_v51 }
 0x1f0   : > { %v2673_v61 = vmul.f32 -1.442695, %v829_v58  ;;  %v3176_v62 = vadd.f32 %v3175_v59, %v3174_v55  ;;  %v975_v63 = vadd.f32 1.0, %v3702_v60  ;;  %v3704_v1 = vpop.eup %3703 }
 0x1f1   : > { %v3177_v0 = vpop.f32.mrf.mxu0 }
 0x1f2   : > { %3717 = vpow2.f32 %v2673_v61  ;;  %v832_v2 = vadd.f32 %v3176_v62, %v4663_v57  ;;  %3326 = vmatpush3.bf16.msra.mxu1 %v3626_v51 }
 0x1f3   : > { %v3706_v3 = vpop.eup %3705  ;;  %v3178_v4 = vpop.f32.mrf.mxu0  ;;  %3719 = vrcp.f32 %v975_v63  ;;  %v3627_v63 = vld [vmem:[#allocation9 + $0x8] sm:$0xff]  }
 0x1f4   : > { %v3708_v5 = vpop.eup %3707  ;;  %v2674_v6 = vmul.f32 -1.442695, %v832_v2  ;;  %v3179_v7 = vadd.f32 %v3178_v4, %v3177_v0  ;;  %v1059_v8 = vpack.c.bf16 %v3706_v3, %v3704_v1  ;;  %3327 = vmatprep.subr.bf16.mxu1 %v3627_v63  ;;  %v3628_v3 = vld [vmem:[#allocation9] sm:$0xff]  }
 0x1f5   : > { %v976_v9 = vadd.f32 1.0, %v3708_v5  ;;  %v3180_v10 = vpop.f32.mrf.mxu0 }
 0x1f6   : > { %3721 = vpow2.f32 %v2674_v6  ;;  %v837_v11 = vadd.f32 %v3179_v7, %v4663_v57  ;;  %3299 = vmatprep.mubr.bf16.mxu1 %v1059_v8  ;;  %3328 = vmatpush3.bf16.msra.mxu1 %v3627_v63 }
 0x1f7   : > { %3723 = vrcp.f32 %v976_v9  ;;  %v3181_v12 = vpop.f32.mrf.mxu0  ;;  %v3710_v13 = vpop.eup %3709  ;;  %3329 = vmatprep.subr.bf16.mxu1 %v3628_v3 }
 0x1f8   : > { %v2675_v14 = vmul.f32 -1.442695, %v837_v11  ;;  %v3182_v15 = vadd.f32 %v3181_v12, %v3180_v10  ;;  %v977_v16 = vadd.f32 1.0, %v3710_v13  ;;  %v3712_v18 = vpop.eup %3711 }
 0x1f9   : > { %v3183_v17 = vpop.f32.mrf.mxu0 }
 0x1fa   : > { %3725 = vpow2.f32 %v2675_v14  ;;  %v840_v19 = vadd.f32 %v3182_v15, %v4663_v57  ;;  %3330 = vmatpush3.bf16.msra.mxu1 %v3628_v3 }
 0x1fb   : > { %v3714_v20 = vpop.eup %3713  ;;  %v3184_v21 = vpop.f32.mrf.mxu0  ;;  %3727 = vrcp.f32 %v977_v16 }
 0x1fc   : > { %v3716_v22 = vpop.eup %3715  ;;  %v2676_v23 = vmul.f32 -1.442695, %v840_v19  ;;  %v3185_v24 = vadd.f32 %v3184_v21, %v3183_v17  ;;  %v1060_v25 = vpack.c.bf16 %v3714_v20, %v3712_v18  ;;  %v4700_v21 = vld [vmem:[%s5007_s4] ss:$0 sm:$0xff] }
 0x1fd   : > { %v978_v26 = vadd.f32 1.0, %v3716_v22  ;;  %v3186_v27 = vpop.f32.mrf.mxu0 }
 0x1fe   : > { %3729 = vpow2.f32 %v2676_v23  ;;  %v845_v28 = vadd.f32 %v3185_v24, %v4663_v57  ;;  %3300 = vmatmul.mubr.bf16.gmra.mxu1 %v1060_v25 }
 0x1ff   : > { %v3718_v29 = vpop.eup %3717  ;;  %3731 = vrcp.f32 %v978_v26  ;;  %v3187_v30 = vpop.f32.mrf.mxu0 }
 0x200   : > { %v2677_v32 = vmul.f32 -1.442695, %v845_v28  ;;  %v3188_v33 = vadd.f32 %v3187_v30, %v3186_v27  ;;  %v979_v34 = vadd.f32 1.0, %v3718_v29  ;;  %v3720_v36 = vpop.eup %3719 }
 0x201   : > { %v3189_v35 = vpop.f32.mrf.mxu0 }
 0x202   : > { %v848_v37 = vadd.f32 %v3188_v33, %v4663_v57  ;;  %3733 = vpow2.f32 %v2677_v32 }
 0x203   : > { %v3722_v38 = vpop.eup %3721  ;;  %v3190_v39 = vpop.f32.mrf.mxu0  ;;  %3735 = vrcp.f32 %v979_v34 }
 0x204   : > { %v3724_v41 = vpop.eup %3723  ;;  %v980_v42 = vadd.f32 1.0, %v3722_v38  ;;  %v2678_v43 = vmul.f32 -1.442695, %v848_v37  ;;  %v3191_v44 = vadd.f32 %v3190_v39, %v3189_v35 }
 0x205   : > { %v3192_v45 = vpop.f32.mrf.mxu0  ;;  %v1061_v46 = vpack.c.bf16 %v3724_v41, %v3720_v36 }
 0x206   : > { %3737 = vrcp.f32 %v980_v42  ;;  %v853_v47 = vadd.f32 %v3191_v44, %v4663_v57 }
 0x207   : > { %v3726_v48 = vpop.eup %3725  ;;  %3739 = vpow2.f32 %v2678_v43  ;;  %3303 = vmatprep.mubr.bf16.mxu1 %v1061_v46  ;;  %v3193_v49 = vpop.f32.mrf.mxu0 }
 0x208   : > { %v2679_v52 = vmul.f32 -1.442695, %v853_v47  ;;  %v3194_v53 = vadd.f32 %v3193_v49, %v3192_v45  ;;  %v981_v54 = vadd.f32 1.0, %v3726_v48  ;;  %v3728_v55 = vpop.eup %3727 }
 0x20a   : > { %v856_v56 = vadd.f32 %v3194_v53, %v4663_v57  ;;  %3741 = vpow2.f32 %v2679_v52 }
 0x20b   : > { %v3730_v58 = vpop.eup %3729  ;;  %3743 = vrcp.f32 %v981_v54 }
 0x20c   : > { %v3732_v59 = vpop.eup %3731  ;;  %v982_v60 = vadd.f32 1.0, %v3730_v58  ;;  %v2680_v61 = vmul.f32 -1.442695, %v856_v56 }
 0x20d   : > { %v1062_v62 = vpack.c.bf16 %v3732_v59, %v3728_v55 }
 0x20e   : > { %3745 = vrcp.f32 %v982_v60 }
 0x20f   : > { %3747 = vpow2.f32 %v2680_v61  ;;  %3304 = vmatmul.mubr.bf16.gmra.mxu1 %v1062_v62  ;;  %v3734_v0 = vpop.eup %3733 }
 0x210   : > { %v3736_v1 = vpop.eup %3735  ;;  %v983_v2 = vadd.f32 1.0, %v3734_v0 }
 0x212   : > { %3749 = vrcp.f32 %v983_v2 }
 0x213   : > { %v3738_v57 = vpop.eup %3737 }
 0x214   : > { %v3740_v4 = vpop.eup %3739  ;;  %v1063_v5 = vpack.c.bf16 %v3738_v57, %v3736_v1 }
 0x215   : > { %v984_v6 = vadd.f32 1.0, %v3740_v4 }
 0x216   : > { %3307 = vmatprep.mubr.bf16.mxu1 %v1063_v5 }
 0x217   : > { %3751 = vrcp.f32 %v984_v6  ;;  %v3742_v7 = vpop.eup %3741 }
 0x218   : > { %v3744_v8 = vpop.eup %3743  ;;  %v985_v9 = vadd.f32 1.0, %v3742_v7 }
 0x21a   : > { %3753 = vrcp.f32 %v985_v9 }
 0x21b   : > { %v3746_v10 = vpop.eup %3745 }
 0x21c   : > { %v3748_v11 = vpop.eup %3747  ;;  %v1064_v12 = vpack.c.bf16 %v3746_v10, %v3744_v8 }
 0x21d   : > { %v986_v13 = vadd.f32 1.0, %v3748_v11 }
 0x21e   : > { %3308 = vmatmul.mubr.bf16.gmra.mxu1 %v1064_v12 }
 0x21f   : > { %3755 = vrcp.f32 %v986_v13  ;;  %v3750_v14 = vpop.eup %3749 }
 0x224   : > { %v3752_v15 = vpop.eup %3751 }
 0x225   : > { %v1065_v16 = vpack.c.bf16 %v3752_v15, %v3750_v14 }
 0x227   : > { %3311 = vmatprep.mubr.bf16.mxu1 %v1065_v16  ;;  %v3754_v17 = vpop.eup %3753 }
 0x22c   : > { %v3756_v18 = vpop.eup %3755 }
 0x22d   : > { %v1066_v19 = vpack.c.bf16 %v3756_v18, %v3754_v17 }
 0x22f   : > { %3312 = vmatmul.mubr.bf16.gmra.mxu1 %v1066_v19 }
 0x27e   : > { %v3285_v20 = vpop.f32.mrf.mxu1 }
 0x27f   : > { %v1181_v26 = vadd.f32 %v3285_v20, %v4700_v21 }
 0x280   : > { %v1172_v22 = vpop.f32.mrf.mxu1 }
 0x281   : > { %v1173_v23 = vadd.f32 %v4700_v21, %v1172_v22 }
 0x282   : > { %v3286_v24 = vpop.f32.mrf.mxu1 }
 0x283   : > { %v1184_v25 = vadd.f32 %v3286_v24, %v4700_v21  ;;  %3757 = vtanh.f32 %v1173_v23 }
 0x284   : > { %v1175_v27 = vpop.f32.mrf.mxu1 }
 0x285   : > { %v1176_v28 = vadd.f32 %v4700_v21, %v1175_v27  ;;  %3759 = vtanh.f32 %v1184_v25 }
 0x287   : > { %3761 = vtanh.f32 %v1176_v28 }
 0x288   : > { %3763 = vtanh.f32 %v1181_v26 }
 0x28f   : > { %v3289_v29 = vpop.f32.mrf.mxu1 }
 0x290   : > { %v3758_v31 = vpop.eup %3757  ;;  %v1197_v38 = vadd.f32 %v3289_v29, %v4700_v21 }
 0x291   : > { %v1188_v30 = vpop.f32.mrf.mxu1 }
 0x292   : > { %v1189_v32 = vadd.f32 %v4700_v21, %v1188_v30  ;;  %v3760_v33 = vpop.eup %3759 }
 0x293   : > { %v3290_v34 = vpop.f32.mrf.mxu1 }
 0x294   : > { %v3762_v35 = vpop.eup %3761  ;;  %v1200_v36 = vadd.f32 %v3290_v34, %v4700_v21  ;;  %3765 = vtanh.f32 %v1189_v32 }
 0x295   : > { %v3764_v37 = vpop.eup %3763  ;;  %v1191_v39 = vpop.f32.mrf.mxu1  ;;  %v1331_v40 = vpack.c.bf16 %v3762_v35, %v3758_v31 }
 0x296   : > { %v1192_v41 = vadd.f32 %v4700_v21, %v1191_v39  ;;  %v1332_v42 = vpack.c.bf16 %v3760_v33, %v3764_v37  ;;  %3767 = vtanh.f32 %v1200_v36 }
 0x297   : > { %3331 = vmatprep.mubr.bf16.mxu1 %v1331_v40 }
 0x298   : > { %3769 = vtanh.f32 %v1192_v41  ;;  %3332 = vmatmul.mubr.bf16.vlgmr.msra.gmra.mxu1 %v1332_v42 }
 0x299   : > { %3771 = vtanh.f32 %v1197_v38 }
 0x29e   : > { %v3293_v43 = vpop.f32.mrf.mxu1 }
 0x29f   : > { %v1213_v50 = vadd.f32 %v3293_v43, %v4700_v21 }
 0x2a0   : > { %v1204_v44 = vpop.f32.mrf.mxu1 }
 0x2a1   : > { %v1205_v45 = vadd.f32 %v4700_v21, %v1204_v44  ;;  %v3766_v47 = vpop.eup %3765 }
 0x2a2   : > { %v3294_v46 = vpop.f32.mrf.mxu1 }
 0x2a3   : > { %v1216_v48 = vadd.f32 %v3294_v46, %v4700_v21  ;;  %v3768_v49 = vpop.eup %3767  ;;  %3773 = vtanh.f32 %v1205_v45 }
 0x2a4   : > { %v1207_v51 = vpop.f32.mrf.mxu1 }
 0x2a5   : > { %v3770_v52 = vpop.eup %3769  ;;  %v1208_v53 = vadd.f32 %v4700_v21, %v1207_v51  ;;  %3775 = vtanh.f32 %v1216_v48 }
 0x2a6   : > { %v3772_v54 = vpop.eup %3771  ;;  %v1333_v55 = vpack.c.bf16 %v3770_v52, %v3766_v47 }
 0x2a7   : > { %3777 = vtanh.f32 %v1208_v53  ;;  %v1334_v56 = vpack.c.bf16 %v3768_v49, %v3772_v54 }
 0x2a8   : > { %3779 = vtanh.f32 %v1213_v50  ;;  %3335 = vmatprep.mubr.bf16.mxu1 %v1333_v55 }
 0x2a9   : > { %3336 = vmatmul.mubr.bf16.gmra.mxu1 %v1334_v56 }
 0x2af   : > { %v3297_v58 = vpop.f32.mrf.mxu1 }
 0x2b0   : > { %v3774_v60 = vpop.eup %3773  ;;  %v1229_v57 = vadd.f32 %v3297_v58, %v4700_v21 }
 0x2b1   : > { %v1220_v59 = vpop.f32.mrf.mxu1 }
 0x2b2   : > { %v1221_v61 = vadd.f32 %v4700_v21, %v1220_v59  ;;  %v3776_v62 = vpop.eup %3775 }
 0x2b3   : > { %v3298_v63 = vpop.f32.mrf.mxu1 }
 0x2b4   : > { %v3778_v0 = vpop.eup %3777  ;;  %v1232_v1 = vadd.f32 %v3298_v63, %v4700_v21  ;;  %3781 = vtanh.f32 %v1221_v61 }
 0x2b5   : > { %v3780_v2 = vpop.eup %3779  ;;  %v1223_v3 = vpop.f32.mrf.mxu1  ;;  %v1335_v4 = vpack.c.bf16 %v3778_v0, %v3774_v60 }
 0x2b6   : > { %v1224_v5 = vadd.f32 %v4700_v21, %v1223_v3  ;;  %v1336_v6 = vpack.c.bf16 %v3776_v62, %v3780_v2  ;;  %3783 = vtanh.f32 %v1232_v1 }
 0x2b7   : > { %3339 = vmatprep.mubr.bf16.mxu1 %v1335_v4 }
 0x2b8   : > { %3785 = vtanh.f32 %v1224_v5  ;;  %3340 = vmatmul.mubr.bf16.gmra.mxu1 %v1336_v6  ;;  %v4737_v6 = vld [vmem:[%s5008_s16] ss:$0 sm:$0xff] }
 0x2b9   : > { %3787 = vtanh.f32 %v1229_v57 }
 0x2be   : > { %v3301_v7 = vpop.f32.mrf.mxu1 }
 0x2bf   : > { %v1245_v14 = vadd.f32 %v3301_v7, %v4700_v21 }
 0x2c0   : > { %v1236_v8 = vpop.f32.mrf.mxu1 }
 0x2c1   : > { %v1237_v9 = vadd.f32 %v4700_v21, %v1236_v8  ;;  %v3782_v11 = vpop.eup %3781 }
 0x2c2   : > { %v3302_v10 = vpop.f32.mrf.mxu1 }
 0x2c3   : > { %v1248_v12 = vadd.f32 %v3302_v10, %v4700_v21  ;;  %v3784_v13 = vpop.eup %3783  ;;  %3789 = vtanh.f32 %v1237_v9 }
 0x2c4   : > { %v1239_v15 = vpop.f32.mrf.mxu1 }
 0x2c5   : > { %v3786_v16 = vpop.eup %3785  ;;  %v1240_v17 = vadd.f32 %v4700_v21, %v1239_v15  ;;  %3791 = vtanh.f32 %v1248_v12 }
 0x2c6   : > { %v3788_v18 = vpop.eup %3787  ;;  %v1337_v19 = vpack.c.bf16 %v3786_v16, %v3782_v11 }
 0x2c7   : > { %3793 = vtanh.f32 %v1240_v17  ;;  %v1338_v20 = vpack.c.bf16 %v3784_v13, %v3788_v18 }
 0x2c8   : > { %3795 = vtanh.f32 %v1245_v14  ;;  %3343 = vmatprep.mubr.bf16.mxu1 %v1337_v19 }
 0x2c9   : > { %3344 = vmatmul.mubr.bf16.gmra.mxu1 %v1338_v20 }
 0x2cf   : > { %v3305_v22 = vpop.f32.mrf.mxu1 }
 0x2d0   : > { %v3790_v24 = vpop.eup %3789  ;;  %v1261_v31 = vadd.f32 %v3305_v22, %v4700_v21 }
 0x2d1   : > { %v1252_v23 = vpop.f32.mrf.mxu1 }
 0x2d2   : > { %v1253_v25 = vadd.f32 %v4700_v21, %v1252_v23  ;;  %v3792_v26 = vpop.eup %3791 }
 0x2d3   : > { %v3306_v27 = vpop.f32.mrf.mxu1 }
 0x2d4   : > { %v3794_v28 = vpop.eup %3793  ;;  %v1264_v29 = vadd.f32 %v3306_v27, %v4700_v21  ;;  %3797 = vtanh.f32 %v1253_v25 }
 0x2d5   : > { %v3796_v30 = vpop.eup %3795  ;;  %v1255_v32 = vpop.f32.mrf.mxu1  ;;  %v1339_v33 = vpack.c.bf16 %v3794_v28, %v3790_v24 }
 0x2d6   : > { %v1256_v34 = vadd.f32 %v4700_v21, %v1255_v32  ;;  %v1340_v35 = vpack.c.bf16 %v3792_v26, %v3796_v30  ;;  %3799 = vtanh.f32 %v1264_v29 }
 0x2d7   : > { %3347 = vmatprep.mubr.bf16.mxu1 %v1339_v33 }
 0x2d8   : > { %3801 = vtanh.f32 %v1256_v34  ;;  %3348 = vmatmul.mubr.bf16.gmra.mxu1 %v1340_v35 }
 0x2d9   : > { %3803 = vtanh.f32 %v1261_v31 }
 0x2de   : > { %v3309_v36 = vpop.f32.mrf.mxu1 }
 0x2df   : > { %v1277_v43 = vadd.f32 %v3309_v36, %v4700_v21 }
 0x2e0   : > { %v1268_v37 = vpop.f32.mrf.mxu1 }
 0x2e1   : > { %v1269_v38 = vadd.f32 %v4700_v21, %v1268_v37  ;;  %v3798_v40 = vpop.eup %3797 }
 0x2e2   : > { %v3310_v39 = vpop.f32.mrf.mxu1 }
 0x2e3   : > { %v1280_v41 = vadd.f32 %v3310_v39, %v4700_v21  ;;  %v3800_v42 = vpop.eup %3799  ;;  %3805 = vtanh.f32 %v1269_v38 }
 0x2e4   : > { %v1271_v44 = vpop.f32.mrf.mxu1 }
 0x2e5   : > { %v3802_v45 = vpop.eup %3801  ;;  %v1272_v46 = vadd.f32 %v4700_v21, %v1271_v44  ;;  %3807 = vtanh.f32 %v1280_v41 }
 0x2e6   : > { %v3804_v47 = vpop.eup %3803  ;;  %v1341_v48 = vpack.c.bf16 %v3802_v45, %v3798_v40 }
 0x2e7   : > { %3809 = vtanh.f32 %v1272_v46  ;;  %v1342_v49 = vpack.c.bf16 %v3800_v42, %v3804_v47 }
 0x2e8   : > { %3811 = vtanh.f32 %v1277_v43  ;;  %3351 = vmatprep.mubr.bf16.mxu1 %v1341_v48 }
 0x2e9   : > { %3352 = vmatmul.mubr.bf16.gmra.mxu1 %v1342_v49 }
 0x2ef   : > { %v3313_v50 = vpop.f32.mrf.mxu1 }
 0x2f0   : > { %v3806_v52 = vpop.eup %3805  ;;  %v1293_v60 = vadd.f32 %v3313_v50, %v4700_v21 }
 0x2f1   : > { %v1284_v51 = vpop.f32.mrf.mxu1 }
 0x2f2   : > { %v1285_v53 = vadd.f32 %v4700_v21, %v1284_v51  ;;  %v3808_v54 = vpop.eup %3807 }
 0x2f3   : > { %v3314_v55 = vpop.f32.mrf.mxu1 }
 0x2f4   : > { %v3810_v56 = vpop.eup %3809  ;;  %v1296_v58 = vadd.f32 %v3314_v55, %v4700_v21  ;;  %3813 = vtanh.f32 %v1285_v53 }
 0x2f5   : > { %v3812_v59 = vpop.eup %3811  ;;  %v1287_v61 = vpop.f32.mrf.mxu1  ;;  %v1343_v62 = vpack.c.bf16 %v3810_v56, %v3806_v52 }
 0x2f6   : > { %v1288_v63 = vadd.f32 %v4700_v21, %v1287_v61  ;;  %v1344_v0 = vpack.c.bf16 %v3808_v54, %v3812_v59  ;;  %3815 = vtanh.f32 %v1296_v58 }
 0x2f7   : > { %3355 = vmatprep.mubr.bf16.mxu1 %v1343_v62 }
 0x2f8   : > { %3817 = vtanh.f32 %v1288_v63  ;;  %3356 = vmatmul.mubr.bf16.gmra.mxu1 %v1344_v0 }
 0x2f9   : > { %3819 = vtanh.f32 %v1293_v60 }
 0x301   : > { %v3814_v1 = vpop.eup %3813 }
 0x303   : > { %v3816_v2 = vpop.eup %3815 }
 0x305   : > { %v3818_v57 = vpop.eup %3817 }
 0x306   : > { %v3820_v3 = vpop.eup %3819  ;;  %v1345_v4 = vpack.c.bf16 %v3818_v57, %v3814_v1 }
 0x307   : > { %v1346_v5 = vpack.c.bf16 %v3816_v2, %v3820_v3 }
 0x308   : > { %3359 = vmatprep.mubr.bf16.mxu1 %v1345_v4 }
 0x309   : > { %3360 = vmatmul.mubr.bf16.gmra.mxu1 %v1346_v5 }
 0x358   : > { %v3333_v21 = vpop.f32.mrf.mxu1 }
 0x359   : > { %v1461_v7 = vadd.f32 %v3333_v21, %v4737_v6 }
 0x35a   : > { %v1452_v8 = vpop.f32.mrf.mxu1 }
 0x35b   : > { %v2701_v9 = vmul.f32 -1.442695, %v1461_v7  ;;  %v1453_v10 = vadd.f32 %v4737_v6, %v1452_v8 }
 0x35c   : > { %v3334_v11 = vpop.f32.mrf.mxu1 }
 0x35d   : > { %3821 = vpow2.f32 %v2701_v9  ;;  %v2699_v12 = vmul.f32 -1.442695, %v1453_v10  ;;  %v1464_v13 = vadd.f32 %v3334_v11, %v4737_v6 }
 0x35e   : > { %v1455_v14 = vpop.f32.mrf.mxu1 }
 0x35f   : > { %3823 = vpow2.f32 %v2699_v12  ;;  %v2702_v15 = vmul.f32 -1.442695, %v1464_v13  ;;  %v1456_v16 = vadd.f32 %v4737_v6, %v1455_v14 }
 0x361   : > { %3825 = vpow2.f32 %v2702_v15  ;;  %v2700_v17 = vmul.f32 -1.442695, %v1456_v16 }
 0x363   : > { %3827 = vpow2.f32 %v2700_v17 }
 0x369   : > { %v3337_v18 = vpop.f32.mrf.mxu1 }
 0x36a   : > { %v3822_v19 = vpop.eup %3821  ;;  %v1477_v20 = vadd.f32 %v3337_v18, %v4737_v6 }
 0x36b   : > { %v1677_v22 = vadd.f32 1.0, %v3822_v19  ;;  %v1468_v23 = vpop.f32.mrf.mxu1 }
 0x36c   : > { %v3824_v24 = vpop.eup %3823  ;;  %v2705_v25 = vmul.f32 -1.442695, %v1477_v20  ;;  %v1469_v26 = vadd.f32 %v4737_v6, %v1468_v23 }
 0x36d   : > { %3829 = vrcp.f32 %v1677_v22  ;;  %v1675_v27 = vadd.f32 1.0, %v3824_v24  ;;  %v3338_v28 = vpop.f32.mrf.mxu1 }
 0x36e   : > { %v3826_v29 = vpop.eup %3825  ;;  %3831 = vpow2.f32 %v2705_v25  ;;  %v2703_v30 = vmul.f32 -1.442695, %v1469_v26  ;;  %v1480_v31 = vadd.f32 %v3338_v28, %v4737_v6 }
 0x36f   : > { %3833 = vrcp.f32 %v1675_v27  ;;  %v1678_v32 = vadd.f32 1.0, %v3826_v29  ;;  %v1471_v33 = vpop.f32.mrf.mxu1 }
 0x370   : > { %v3828_v34 = vpop.eup %3827  ;;  %3835 = vpow2.f32 %v2703_v30  ;;  %v2706_v35 = vmul.f32 -1.442695, %v1480_v31  ;;  %v1472_v36 = vadd.f32 %v4737_v6, %v1471_v33 }
 0x371   : > { %3837 = vrcp.f32 %v1678_v32  ;;  %v1676_v37 = vadd.f32 1.0, %v3828_v34 }
 0x372   : > { %3839 = vpow2.f32 %v2706_v35  ;;  %v2704_v38 = vmul.f32 -1.442695, %v1472_v36 }
 0x373   : > { %3841 = vrcp.f32 %v1676_v37 }
 0x374   : > { %3843 = vpow2.f32 %v2704_v38 }
 0x378   : > { %v3341_v39 = vpop.f32.mrf.mxu1 }
 0x379   : > { %v1493_v40 = vadd.f32 %v3341_v39, %v4737_v6 }
 0x37a   : > { %v3830_v41 = vpop.eup %3829  ;;  %v1484_v42 = vpop.f32.mrf.mxu1 }
 0x37b   : > { %v3832_v43 = vpop.eup %3831  ;;  %v2709_v44 = vmul.f32 -1.442695, %v1493_v40  ;;  %v1485_v45 = vadd.f32 %v4737_v6, %v1484_v42 }
 0x37c   : > { %v3834_v46 = vpop.eup %3833  ;;  %v1681_v47 = vadd.f32 1.0, %v3832_v43  ;;  %v3342_v48 = vpop.f32.mrf.mxu1 }
 0x37d   : > { %v3836_v49 = vpop.eup %3835  ;;  %3845 = vpow2.f32 %v2709_v44  ;;  %v2707_v50 = vmul.f32 -1.442695, %v1485_v45  ;;  %v1496_v51 = vadd.f32 %v3342_v48, %v4737_v6 }
 0x37e   : > { %v3838_v52 = vpop.eup %3837  ;;  %3847 = vrcp.f32 %v1681_v47  ;;  %v1679_v53 = vadd.f32 1.0, %v3836_v49  ;;  %v1487_v54 = vpop.f32.mrf.mxu1 }
 0x37f   : > { %v3840_v55 = vpop.eup %3839  ;;  %v2901_v56 = vpack.c.bf16 %v3838_v52, %v3830_v41  ;;  %3849 = vpow2.f32 %v2707_v50  ;;  %v2710_v58 = vmul.f32 -1.442695, %v1496_v51  ;;  %v1488_v59 = vadd.f32 %v4737_v6, %v1487_v54 }
 0x380   : > { %v3842_v60 = vpop.eup %3841  ;;  %3851 = vrcp.f32 %v1679_v53  ;;  %v1682_v61 = vadd.f32 1.0, %v3840_v55 }
 0x381   : > { %v3844_v62 = vpop.eup %3843  ;;  %3053 = vst [vmem:[#allocation2 + $0x8] sm:$0xff] %v2901_v56   ;;  %v2896_v63 = vpack.c.bf16 %v3842_v60, %v3834_v46  ;;  %3853 = vpow2.f32 %v2710_v58  ;;  %v2708_v0 = vmul.f32 -1.442695, %v1488_v59 }
 0x382   : > { %3855 = vrcp.f32 %v1682_v61  ;;  %v1680_v1 = vadd.f32 1.0, %v3844_v62 }
 0x383   : > { %2897 = vst [vmem:[#allocation2] sm:$0xff] %v2896_v63   ;;  %3857 = vpow2.f32 %v2708_v0 }
 0x384   : > { %3859 = vrcp.f32 %v1680_v1 }
 0x389   : > { %v3345_v2 = vpop.f32.mrf.mxu1 }
 0x38a   : > { %v3846_v57 = vpop.eup %3845  ;;  %v1509_v3 = vadd.f32 %v3345_v2, %v4737_v6 }
 0x38b   : > { %v3848_v4 = vpop.eup %3847  ;;  %v1685_v5 = vadd.f32 1.0, %v3846_v57  ;;  %v1500_v21 = vpop.f32.mrf.mxu1 }
 0x38c   : > { %v3850_v7 = vpop.eup %3849  ;;  %v2713_v8 = vmul.f32 -1.442695, %v1509_v3  ;;  %v1501_v9 = vadd.f32 %v4737_v6, %v1500_v21 }
 0x38d   : > { %v3852_v10 = vpop.eup %3851  ;;  %3861 = vrcp.f32 %v1685_v5  ;;  %v1683_v11 = vadd.f32 1.0, %v3850_v7  ;;  %v3346_v12 = vpop.f32.mrf.mxu1 }
 0x38e   : > { %v3854_v13 = vpop.eup %3853  ;;  %3863 = vpow2.f32 %v2713_v8  ;;  %v2711_v14 = vmul.f32 -1.442695, %v1501_v9  ;;  %v1512_v15 = vadd.f32 %v3346_v12, %v4737_v6 }
 0x38f   : > { %v3856_v16 = vpop.eup %3855  ;;  %3865 = vrcp.f32 %v1683_v11  ;;  %v1686_v17 = vadd.f32 1.0, %v3854_v13  ;;  %v1503_v18 = vpop.f32.mrf.mxu1 }
 0x390   : > { %v3858_v19 = vpop.eup %3857  ;;  %v2911_v20 = vpack.c.bf16 %v3856_v16, %v3848_v4  ;;  %3867 = vpow2.f32 %v2711_v14  ;;  %v2714_v22 = vmul.f32 -1.442695, %v1512_v15  ;;  %v1504_v23 = vadd.f32 %v4737_v6, %v1503_v18 }
 0x391   : > { %v3860_v24 = vpop.eup %3859  ;;  %3869 = vrcp.f32 %v1686_v17  ;;  %v1684_v25 = vadd.f32 1.0, %v3858_v19 }
 0x392   : > { %3055 = vst [vmem:[#allocation2 + $0x18] sm:$0xff] %v2911_v20   ;;  %v2906_v26 = vpack.c.bf16 %v3860_v24, %v3852_v10  ;;  %3871 = vpow2.f32 %v2714_v22  ;;  %v2712_v27 = vmul.f32 -1.442695, %v1504_v23 }
 0x393   : > { %3873 = vrcp.f32 %v1684_v25 }
 0x394   : > { %3054 = vst [vmem:[#allocation2 + $0x10] sm:$0xff] %v2906_v26   ;;  %3875 = vpow2.f32 %v2712_v27 }
 0x398   : > { %v3349_v28 = vpop.f32.mrf.mxu1 }
 0x399   : > { %v1525_v29 = vadd.f32 %v3349_v28, %v4737_v6 }
 0x39a   : > { %v3862_v30 = vpop.eup %3861  ;;  %v1516_v31 = vpop.f32.mrf.mxu1 }
 0x39b   : > { %v3864_v32 = vpop.eup %3863  ;;  %v2717_v33 = vmul.f32 -1.442695, %v1525_v29  ;;  %v1517_v34 = vadd.f32 %v4737_v6, %v1516_v31 }
 0x39c   : > { %v3866_v35 = vpop.eup %3865  ;;  %v1689_v36 = vadd.f32 1.0, %v3864_v32  ;;  %v3350_v37 = vpop.f32.mrf.mxu1 }
 0x39d   : > { %v3868_v38 = vpop.eup %3867  ;;  %3877 = vpow2.f32 %v2717_v33  ;;  %v2715_v39 = vmul.f32 -1.442695, %v1517_v34  ;;  %v1528_v40 = vadd.f32 %v3350_v37, %v4737_v6 }
 0x39e   : > { %v3870_v41 = vpop.eup %3869  ;;  %3879 = vrcp.f32 %v1689_v36  ;;  %v1687_v42 = vadd.f32 1.0, %v3868_v38  ;;  %v1519_v43 = vpop.f32.mrf.mxu1 }
 0x39f   : > { %v3872_v44 = vpop.eup %3871  ;;  %v2921_v45 = vpack.c.bf16 %v3870_v41, %v3862_v30  ;;  %3881 = vpow2.f32 %v2715_v39  ;;  %v2718_v46 = vmul.f32 -1.442695, %v1528_v40  ;;  %v1520_v47 = vadd.f32 %v4737_v6, %v1519_v43 }
 0x3a0   : > { %v3874_v48 = vpop.eup %3873  ;;  %3883 = vrcp.f32 %v1687_v42  ;;  %v1690_v49 = vadd.f32 1.0, %v3872_v44 }
 0x3a1   : > { %v3876_v50 = vpop.eup %3875  ;;  %3057 = vst [vmem:[#allocation2 + $0x28] sm:$0xff] %v2921_v45   ;;  %v2916_v51 = vpack.c.bf16 %v3874_v48, %v3866_v35  ;;  %3885 = vpow2.f32 %v2718_v46  ;;  %v2716_v52 = vmul.f32 -1.442695, %v1520_v47 }
 0x3a2   : > { %3887 = vrcp.f32 %v1690_v49  ;;  %v1688_v53 = vadd.f32 1.0, %v3876_v50 }
 0x3a3   : > { %3056 = vst [vmem:[#allocation2 + $0x20] sm:$0xff] %v2916_v51   ;;  %3889 = vpow2.f32 %v2716_v52 }
 0x3a4   : > { %3891 = vrcp.f32 %v1688_v53 }
 0x3a9   : > { %v3353_v54 = vpop.f32.mrf.mxu1 }
 0x3aa   : > { %v3878_v55 = vpop.eup %3877  ;;  %v1541_v56 = vadd.f32 %v3353_v54, %v4737_v6 }
 0x3ab   : > { %v3880_v58 = vpop.eup %3879  ;;  %v1693_v59 = vadd.f32 1.0, %v3878_v55  ;;  %v1532_v60 = vpop.f32.mrf.mxu1 }
 0x3ac   : > { %v3882_v61 = vpop.eup %3881  ;;  %v2721_v62 = vmul.f32 -1.442695, %v1541_v56  ;;  %v1533_v63 = vadd.f32 %v4737_v6, %v1532_v60 }
 0x3ad   : > { %v3884_v0 = vpop.eup %3883  ;;  %3893 = vrcp.f32 %v1693_v59  ;;  %v1691_v1 = vadd.f32 1.0, %v3882_v61  ;;  %v3354_v2 = vpop.f32.mrf.mxu1 }
 0x3ae   : > { %v3886_v57 = vpop.eup %3885  ;;  %3895 = vpow2.f32 %v2721_v62  ;;  %v2719_v3 = vmul.f32 -1.442695, %v1533_v63  ;;  %v1544_v4 = vadd.f32 %v3354_v2, %v4737_v6 }
 0x3af   : > { %v3888_v5 = vpop.eup %3887  ;;  %3897 = vrcp.f32 %v1691_v1  ;;  %v1694_v21 = vadd.f32 1.0, %v3886_v57  ;;  %v1535_v7 = vpop.f32.mrf.mxu1 }
 0x3b0   : > { %v3890_v8 = vpop.eup %3889  ;;  %v2931_v9 = vpack.c.bf16 %v3888_v5, %v3880_v58  ;;  %3899 = vpow2.f32 %v2719_v3  ;;  %v2722_v10 = vmul.f32 -1.442695, %v1544_v4  ;;  %v1536_v11 = vadd.f32 %v4737_v6, %v1535_v7 }
 0x3b1   : > { %v3892_v12 = vpop.eup %3891  ;;  %3901 = vrcp.f32 %v1694_v21  ;;  %v1692_v13 = vadd.f32 1.0, %v3890_v8 }
 0x3b2   : > { %3059 = vst [vmem:[#allocation2 + $0x38] sm:$0xff] %v2931_v9   ;;  %v2926_v14 = vpack.c.bf16 %v3892_v12, %v3884_v0  ;;  %3903 = vpow2.f32 %v2722_v10  ;;  %v2720_v15 = vmul.f32 -1.442695, %v1536_v11 }
 0x3b3   : > { %3905 = vrcp.f32 %v1692_v13 }
 0x3b4   : > { %3058 = vst [vmem:[#allocation2 + $0x30] sm:$0xff] %v2926_v14   ;;  %3907 = vpow2.f32 %v2720_v15 }
 0x3b8   : > { %v3357_v16 = vpop.f32.mrf.mxu1 }
 0x3b9   : > { %v1557_v17 = vadd.f32 %v3357_v16, %v4737_v6 }
 0x3ba   : > { %v3894_v18 = vpop.eup %3893  ;;  %v1548_v19 = vpop.f32.mrf.mxu1 }
 0x3bb   : > { %v3896_v20 = vpop.eup %3895  ;;  %v2725_v22 = vmul.f32 -1.442695, %v1557_v17  ;;  %v1549_v23 = vadd.f32 %v4737_v6, %v1548_v19 }
 0x3bc   : > { %v3898_v24 = vpop.eup %3897  ;;  %v1697_v25 = vadd.f32 1.0, %v3896_v20  ;;  %v3358_v26 = vpop.f32.mrf.mxu1 }
 0x3bd   : > { %v3900_v27 = vpop.eup %3899  ;;  %3909 = vpow2.f32 %v2725_v22  ;;  %v2723_v28 = vmul.f32 -1.442695, %v1549_v23  ;;  %v1560_v29 = vadd.f32 %v3358_v26, %v4737_v6 }
 0x3be   : > { %v3902_v30 = vpop.eup %3901  ;;  %3911 = vrcp.f32 %v1697_v25  ;;  %v1695_v31 = vadd.f32 1.0, %v3900_v27  ;;  %v1551_v32 = vpop.f32.mrf.mxu1 }
 0x3bf   : > { %v3904_v33 = vpop.eup %3903  ;;  %v2941_v34 = vpack.c.bf16 %v3902_v30, %v3894_v18  ;;  %3913 = vpow2.f32 %v2723_v28  ;;  %v2726_v35 = vmul.f32 -1.442695, %v1560_v29  ;;  %v1552_v36 = vadd.f32 %v4737_v6, %v1551_v32 }
 0x3c0   : > { %v3906_v37 = vpop.eup %3905  ;;  %3915 = vrcp.f32 %v1695_v31  ;;  %v1698_v38 = vadd.f32 1.0, %v3904_v33 }
 0x3c1   : > { %v3908_v39 = vpop.eup %3907  ;;  %3061 = vst [vmem:[#allocation2 + $0x48] sm:$0xff] %v2941_v34   ;;  %v2936_v40 = vpack.c.bf16 %v3906_v37, %v3898_v24  ;;  %3917 = vpow2.f32 %v2726_v35  ;;  %v2724_v41 = vmul.f32 -1.442695, %v1552_v36 }
 0x3c2   : > { %3919 = vrcp.f32 %v1698_v38  ;;  %v1696_v42 = vadd.f32 1.0, %v3908_v39 }
 0x3c3   : > { %3060 = vst [vmem:[#allocation2 + $0x40] sm:$0xff] %v2936_v40   ;;  %3921 = vpow2.f32 %v2724_v41 }
 0x3c4   : > { %3923 = vrcp.f32 %v1696_v42 }
 0x3c9   : > { %v3361_v43 = vpop.f32.mrf.mxu1 }
 0x3ca   : > { %v3910_v44 = vpop.eup %3909  ;;  %v1573_v45 = vadd.f32 %v3361_v43, %v4737_v6 }
 0x3cb   : > { %v3912_v46 = vpop.eup %3911  ;;  %v1701_v47 = vadd.f32 1.0, %v3910_v44  ;;  %v1564_v48 = vpop.f32.mrf.mxu1 }
 0x3cc   : > { %v3914_v49 = vpop.eup %3913  ;;  %v2729_v50 = vmul.f32 -1.442695, %v1573_v45  ;;  %v1565_v51 = vadd.f32 %v4737_v6, %v1564_v48 }
 0x3cd   : > { %v3916_v52 = vpop.eup %3915  ;;  %3925 = vrcp.f32 %v1701_v47  ;;  %v1699_v53 = vadd.f32 1.0, %v3914_v49  ;;  %v3362_v54 = vpop.f32.mrf.mxu1 }
 0x3ce   : > { %v3918_v55 = vpop.eup %3917  ;;  %3927 = vpow2.f32 %v2729_v50  ;;  %v2727_v56 = vmul.f32 -1.442695, %v1565_v51  ;;  %v1576_v58 = vadd.f32 %v3362_v54, %v4737_v6 }
 0x3cf   : > { %v3920_v59 = vpop.eup %3919  ;;  %3929 = vrcp.f32 %v1699_v53  ;;  %v1702_v60 = vadd.f32 1.0, %v3918_v55  ;;  %v1567_v61 = vpop.f32.mrf.mxu1 }
 0x3d0   : > { %v3922_v62 = vpop.eup %3921  ;;  %v2951_v63 = vpack.c.bf16 %v3920_v59, %v3912_v46  ;;  %3931 = vpow2.f32 %v2727_v56  ;;  %v2730_v0 = vmul.f32 -1.442695, %v1576_v58  ;;  %v1568_v1 = vadd.f32 %v4737_v6, %v1567_v61 }
 0x3d1   : > { %v3924_v2 = vpop.eup %3923  ;;  %3933 = vrcp.f32 %v1702_v60  ;;  %v1700_v57 = vadd.f32 1.0, %v3922_v62 }
 0x3d2   : > { %3063 = vst [vmem:[#allocation2 + $0x58] sm:$0xff] %v2951_v63   ;;  %v2946_v3 = vpack.c.bf16 %v3924_v2, %v3916_v52  ;;  %3935 = vpow2.f32 %v2730_v0  ;;  %v2728_v4 = vmul.f32 -1.442695, %v1568_v1 }
 0x3d3   : > { %3937 = vrcp.f32 %v1700_v57 }
 0x3d4   : > { %3062 = vst [vmem:[#allocation2 + $0x50] sm:$0xff] %v2946_v3   ;;  %3939 = vpow2.f32 %v2728_v4 }
 0x3da   : > { %v3926_v5 = vpop.eup %3925 }
 0x3db   : > { %v3928_v21 = vpop.eup %3927 }
 0x3dc   : > { %v3930_v7 = vpop.eup %3929  ;;  %v1705_v9 = vadd.f32 1.0, %v3928_v21 }
 0x3dd   : > { %v3932_v8 = vpop.eup %3931 }
 0x3de   : > { %v3934_v10 = vpop.eup %3933  ;;  %v1703_v13 = vadd.f32 1.0, %v3932_v8  ;;  %3941 = vrcp.f32 %v1705_v9 }
 0x3df   : > { %v3936_v11 = vpop.eup %3935  ;;  %v2961_v12 = vpack.c.bf16 %v3934_v10, %v3926_v5 }
 0x3e0   : > { %v3938_v6 = vpop.eup %3937  ;;  %v1706_v14 = vadd.f32 1.0, %v3936_v11 }
 0x3e1   : > { %v3940_v15 = vpop.eup %3939  ;;  %3065 = vst [vmem:[#allocation2 + $0x68] sm:$0xff] %v2961_v12   ;;  %v2956_v16 = vpack.c.bf16 %v3938_v6, %v3930_v7 }
 0x3e2   : > { %3943 = vrcp.f32 %v1706_v14  ;;  %v1704_v17 = vadd.f32 1.0, %v3940_v15 }
 0x3e3   : > { %3064 = vst [vmem:[#allocation2 + $0x60] sm:$0xff] %v2956_v16   ;;  %3945 = vrcp.f32 %v1703_v13 }
 0x3e4   : > { %3947 = vrcp.f32 %v1704_v17 }
 0x3eb   : > { %v3942_v18 = vpop.eup %3941 }
 0x3ef   : > { %v3944_v19 = vpop.eup %3943 }
 0x3f0   : > { %v3946_v20 = vpop.eup %3945  ;;  %v2971_v22 = vpack.c.bf16 %v3944_v19, %v3942_v18 }
 0x3f1   : > { %v3948_v23 = vpop.eup %3947 }
 0x3f2   : > { %3067 = vst [vmem:[#allocation2 + $0x78] sm:$0xff] %v2971_v22   ;;  %v2966_v24 = vpack.c.bf16 %v3948_v23, %v3946_v20 }
 0x3f4   : > { %3066 = vst [vmem:[#allocation2 + $0x70] sm:$0xff] %v2966_v24  }
 0x3f5 PF: > { %v3949_v25 = vld [vmem:[%s4576_s13 + $0x38] sm:$0xff]   ;;  %v3950_v26 = vld [vmem:[%s4576_s13 + $0x30] sm:$0xff]   ;;  %v3951_v27 = vld [vmem:[%s4576_s13 + $0x28] sm:$0xff]   ;;  %s5010_s25 = sld [smem:[#allocation23_spill]]  ;;  %s2467_s9 = sshll.u32 %s4593_s12, 4  ;;  %s4838_s9 = int_to_ptr.vmem [resolvable:$true] %s2467_s9 }
 0x3f6   : > { %3363 = vmatprep.subr.bf16.mxu0 %v3949_v25  ;;  %3411 = vmatprep.subr.bf16.mxu1 %v3949_v25  ;;  %v3952_v28 = vld [vmem:[%s4576_s13 + $0x20] sm:$0xff]   ;;  %v3953_v31 = vld [vmem:[%s4576_s13 + $0x18] sm:$0xff]   ;;  %v3954_v32 = vld [vmem:[%s4576_s13 + $0x10] sm:$0xff]   ;;  %s5011_s26 = sld [smem:[#allocation22_spill]]  ;;  %s4846_s1 = scalar_lea.sflag [#allocation5], %s454_s10 }
 0x3f7   : > { %3364 = vmatpush3.bf16.msra.mxu0 %v3949_v25  ;;  %3419 = vmatpush3.bf16.msra.mxu1 %v3949_v25  ;;  %v3957_v29 = vld [vmem:[#allocation2] sm:$0xff]   ;;  %v3955_v33 = vld [vmem:[%s4576_s13 + $0x8] sm:$0xff]   ;;  %v3961_v37 = vld [vmem:[#allocation2 + $0x10] sm:$0xff]   ;;  %s5013_s28 = sld [smem:[#allocation26_spill]]  ;;  %s4107_s16 = scalar_lea.vmem %s4838_s9, 2048 }
 0x3f8   : > { %3365 = vmatprep.subr.bf16.mxu0 %v3950_v26  ;;  %3412 = vmatprep.subr.bf16.mxu1 %v3950_v26  ;;  %v3958_v30 = vld [vmem:[#allocation2 + $0x40] sm:$0xff]   ;;  %v3959_v35 = vld [vmem:[#allocation2 + $0x8] sm:$0xff]   ;;  %v3962_v38 = vld [vmem:[#allocation2 + $0x50] sm:$0xff]   ;;  %s5014_s4 = sld [smem:[#allocation36_spill]]  ;;  %p4108_p9 = scmp.ne.s32.totalorder %s4838_s9, %s4107_s16 }
 0x3f9   : > { %3379 = vmatprep.mubr.bf16.mxu0 %v3957_v29  ;;  %3395 = vmatprep.mubr.bf16.mxu1 %v3958_v30  ;;  %v3956_v34 = vld [vmem:[%s4576_s13] sm:$0xff]   ;;  %v3960_v36 = vld [vmem:[#allocation2 + $0x48] sm:$0xff]   ;;  %v3963_v39 = vld [vmem:[#allocation2 + $0x18] sm:$0xff]   ;;  %s4275_s13 = smov [#allocation12]  }
 0x3fa   : > { %v3964_v40 = vld [vmem:[#allocation2 + $0x58] sm:$0xff]   ;;  %v3965_v41 = vld [vmem:[#allocation2 + $0x20] sm:$0xff]   ;;  %v3967_v43 = vld [vmem:[#allocation2 + $0x28] sm:$0xff]   ;;  %s4111_s30 = sshll.u32 %s4275_s13, 4  ;;  %s4112_s30 = int_to_ptr.vmem [resolvable:$false] %s4111_s30 }
 0x3fb   : > { %3366 = vmatpush3.bf16.msra.mxu0 %v3950_v26  ;;  %3420 = vmatpush3.bf16.msra.mxu1 %v3950_v26  ;;  %v3966_v42 = vld [vmem:[#allocation2 + $0x60] sm:$0xff]   ;;  %v3968_v44 = vld [vmem:[#allocation2 + $0x68] sm:$0xff]   ;;  %v3969_v45 = vld [vmem:[#allocation2 + $0x30] sm:$0xff]   ;;  %s2892_s6 = sshll.u32 %s5010_s25, 6  ;;  %s4113_s23 = scalar_lea.vmem %s4112_s30, 4096 }
 0x3fc   : > { %3367 = vmatprep.subr.bf16.mxu0 %v3951_v27  ;;  %3413 = vmatprep.subr.bf16.mxu1 %v3951_v27  ;;  %v3970_v46 = vld [vmem:[#allocation2 + $0x70] sm:$0xff]   ;;  %v3971_v47 = vld [vmem:[#allocation2 + $0x38] sm:$0xff]   ;;  %v4784_v51 = vld [vmem:[%s460_s18] ss:$0 sm:$0xff]  ;;  %s2464_s19 = sadd.s32 %s5011_s26, %s2892_s6  ;;  %p4114_p6 = scmp.lt.s32.totalorder %s4838_s9, %s4112_s30 }
 0x3fd   : > { %v3972_v48 = vld [vmem:[#allocation2 + $0x78] sm:$0xff]   ;;  %s2823_s18 = sshll.u32 %s2464_s19, 6  ;;  %p5015_p13 = scmp.ne.s32.totalorder %s5013_s28, 0 }
 0x3fe   : > { %s4836_s27 = scalar_lea.hbm %s5014_s4, %s2823_s18  ;;  %p4115_p12 = scmp.lt.s32.totalorder %s4113_s23, %s4107_s16 }
 0x3ff   : > { %3368 = vmatpush3.bf16.msra.mxu0 %v3951_v27  ;;  %3421 = vmatpush3.bf16.msra.mxu1 %v3951_v27  ;;  %p4109_p4 = pnand %p4108_p9, %p5015_p13 }
 0x400   : > { %3369 = vmatprep.subr.bf16.mxu0 %v3952_v28  ;;  %3414 = vmatprep.subr.bf16.mxu1 %v3952_v28  ;;  %p4116_p8 = por %p4115_p12, %p4114_p6 }
 0x401   : > { %p4110_p5 = pneg %p4109_p4 }
 0x403   : > { %3370 = vmatpush3.bf16.msra.mxu0 %v3952_v28  ;;  %3422 = vmatpush3.bf16.msra.mxu1 %v3952_v28  ;;  %p4117_p1 = pnand %p4116_p8, %p4110_p5 }
 0x404   : > { %3371 = vmatprep.subr.bf16.mxu0 %v3953_v31  ;;  %3415 = vmatprep.subr.bf16.mxu1 %v3953_v31 }
 0x407   : > { %3372 = vmatpush3.bf16.msra.mxu0 %v3953_v31  ;;  %3423 = vmatpush3.bf16.msra.mxu1 %v3953_v31 }
 0x408   : > { %3373 = vmatprep.subr.bf16.mxu0 %v3954_v32  ;;  %3416 = vmatprep.subr.bf16.mxu1 %v3954_v32 }
 0x40b   : > { %3374 = vmatpush3.bf16.msra.mxu0 %v3954_v32  ;;  %3424 = vmatpush3.bf16.msra.mxu1 %v3954_v32 }
 0x40c   : > { %3375 = vmatprep.subr.bf16.mxu0 %v3955_v33  ;;  %3417 = vmatprep.subr.bf16.mxu1 %v3955_v33 }
 0x40f   : > { %3376 = vmatpush3.bf16.msra.mxu0 %v3955_v33  ;;  %3425 = vmatpush3.bf16.msra.mxu1 %v3955_v33 }
 0x410   : > { %3377 = vmatprep.subr.bf16.mxu0 %v3956_v34  ;;  %3418 = vmatprep.subr.bf16.mxu1 %v3956_v34 }
 0x413   : > { %3378 = vmatpush3.bf16.msra.mxu0 %v3956_v34  ;;  %3426 = vmatpush3.bf16.msra.mxu1 %v3956_v34 }
 0x416   : > { %3380 = vmatmul.mubr.bf16.vlgmr.msra.gmra.mxu0 %v3959_v35  ;;  %3396 = vmatmul.mubr.bf16.vlgmr.msra.gmra.mxu1 %v3960_v36 }
 0x417   : > { %3383 = vmatprep.mubr.bf16.mxu0 %v3961_v37  ;;  %3399 = vmatprep.mubr.bf16.mxu1 %v3962_v38 }
 0x41e   : > { %3384 = vmatmul.mubr.bf16.gmra.mxu0 %v3963_v39  ;;  %3400 = vmatmul.mubr.bf16.gmra.mxu1 %v3964_v40 }
 0x41f   : > { %3387 = vmatprep.mubr.bf16.mxu0 %v3965_v41  ;;  %3403 = vmatprep.mubr.bf16.mxu1 %v3966_v42 }
 0x426   : > { %3388 = vmatmul.mubr.bf16.gmra.mxu0 %v3967_v43  ;;  %3404 = vmatmul.mubr.bf16.gmra.mxu1 %v3968_v44 }
 0x427   : > { %3391 = vmatprep.mubr.bf16.mxu0 %v3969_v45  ;;  %3407 = vmatprep.mubr.bf16.mxu1 %v3970_v46 }
 0x42e   : > { %3392 = vmatmul.mubr.bf16.gmra.mxu0 %v3971_v47  ;;  %3408 = vmatmul.mubr.bf16.gmra.mxu1 %v3972_v48 }
 0x4d6   : > { %v3381_v49 = vpop.f32.mrf.mxu0  ;;  %v3397_v50 = vpop.f32.mrf.mxu1 }
 0x4d7   : > { %v2173_v56 = vadd.f32 %v3381_v49, %v4784_v51  ;;  %v2237_v58 = vadd.f32 %v3397_v50, %v4784_v51 }
 0x4d8   : > { %v2164_v52 = vpop.f32.mrf.mxu0  ;;  %v2228_v53 = vpop.f32.mrf.mxu1 }
 0x4d9   : > { %v2165_v61 = vadd.f32 %v4784_v51, %v2164_v52  ;;  %v2229_v62 = vadd.f32 %v4784_v51, %v2228_v53 }
 0x4da   : > { %v3382_v54 = vpop.f32.mrf.mxu0  ;;  %v3398_v55 = vpop.f32.mrf.mxu1 }
 0x4db   : > { %v2176_v59 = vadd.f32 %v3382_v54, %v4784_v51  ;;  %v2240_v60 = vadd.f32 %v3398_v55, %v4784_v51 }
 0x4dc   : > { %v2167_v63 = vpop.f32.mrf.mxu0  ;;  %v2231_v0 = vpop.f32.mrf.mxu1 }
 0x4dd   : > { %v2981_v1 = vpack.c.bf16 %v2176_v59, %v2173_v56  ;;  %v3021_v2 = vpack.c.bf16 %v2240_v60, %v2237_v58  ;;  %v2168_v57 = vadd.f32 %v4784_v51, %v2167_v63  ;;  %v2232_v3 = vadd.f32 %v4784_v51, %v2231_v0 }
 0x4de   : > { %v3385_v4 = vpop.f32.mrf.mxu0  ;;  %v3401_v5 = vpop.f32.mrf.mxu1 }
 0x4df   : > { %3068 = vst [vmem:[%s4593_s12 + $0x8] sm:$0xff] %v2981_v1   ;;  %3076 = vst [vmem:[%s4593_s12 + $0x48] sm:$0xff] %v3021_v2   ;;  %v2976_v21 = vpack.c.bf16 %v2168_v57, %v2165_v61  ;;  %v3016_v7 = vpack.c.bf16 %v2232_v3, %v2229_v62  ;;  %v2189_v12 = vadd.f32 %v3385_v4, %v4784_v51 }
 0x4e0   : > { %v2180_v8 = vpop.f32.mrf.mxu0  ;;  %v2244_v9 = vpop.f32.mrf.mxu1  ;;  %v2253_v13 = vadd.f32 %v3401_v5, %v4784_v51 }
 0x4e1   : > { %2977 = vst [vmem:[%s4593_s12] sm:$0xff] %v2976_v21   ;;  %3075 = vst [vmem:[%s4593_s12 + $0x40] sm:$0xff] %v3016_v7   ;;  %v2181_v15 = vadd.f32 %v4784_v51, %v2180_v8  ;;  %v2245_v16 = vadd.f32 %v4784_v51, %v2244_v9 }
 0x4e2   : > { %v3386_v10 = vpop.f32.mrf.mxu0  ;;  %v3402_v11 = vpop.f32.mrf.mxu1 }
 0x4e3   : > { %v2192_v6 = vadd.f32 %v3386_v10, %v4784_v51  ;;  %v2256_v14 = vadd.f32 %v3402_v11, %v4784_v51 }
 0x4e4   : > { %v2183_v17 = vpop.f32.mrf.mxu0  ;;  %v2247_v18 = vpop.f32.mrf.mxu1 }
 0x4e5   : > { %v2991_v19 = vpack.c.bf16 %v2192_v6, %v2189_v12  ;;  %v3031_v20 = vpack.c.bf16 %v2256_v14, %v2253_v13  ;;  %v2184_v22 = vadd.f32 %v4784_v51, %v2183_v17  ;;  %v2248_v23 = vadd.f32 %v4784_v51, %v2247_v18 }
 0x4e6   : > { %v3389_v24 = vpop.f32.mrf.mxu0  ;;  %v3405_v25 = vpop.f32.mrf.mxu1 }
 0x4e7   : > { %3070 = vst [vmem:[%s4593_s12 + $0x18] sm:$0xff] %v2991_v19   ;;  %3078 = vst [vmem:[%s4593_s12 + $0x58] sm:$0xff] %v3031_v20   ;;  %v2986_v26 = vpack.c.bf16 %v2184_v22, %v2181_v15  ;;  %v3026_v27 = vpack.c.bf16 %v2248_v23, %v2245_v16  ;;  %v2205_v32 = vadd.f32 %v3389_v24, %v4784_v51 }
 0x4e8   : > { %v2196_v28 = vpop.f32.mrf.mxu0  ;;  %v2260_v29 = vpop.f32.mrf.mxu1  ;;  %v2269_v33 = vadd.f32 %v3405_v25, %v4784_v51 }
 0x4e9   : > { %3069 = vst [vmem:[%s4593_s12 + $0x10] sm:$0xff] %v2986_v26   ;;  %3077 = vst [vmem:[%s4593_s12 + $0x50] sm:$0xff] %v3026_v27   ;;  %v2197_v36 = vadd.f32 %v4784_v51, %v2196_v28  ;;  %v2261_v37 = vadd.f32 %v4784_v51, %v2260_v29 }
 0x4ea   : > { %v3390_v30 = vpop.f32.mrf.mxu0  ;;  %v3406_v31 = vpop.f32.mrf.mxu1 }
 0x4eb   : > { %v2208_v34 = vadd.f32 %v3390_v30, %v4784_v51  ;;  %v2272_v35 = vadd.f32 %v3406_v31, %v4784_v51 }
 0x4ec   : > { %v2199_v38 = vpop.f32.mrf.mxu0  ;;  %v2263_v39 = vpop.f32.mrf.mxu1 }
 0x4ed   : > { %v3001_v40 = vpack.c.bf16 %v2208_v34, %v2205_v32  ;;  %v3041_v41 = vpack.c.bf16 %v2272_v35, %v2269_v33  ;;  %v2200_v42 = vadd.f32 %v4784_v51, %v2199_v38  ;;  %v2264_v43 = vadd.f32 %v4784_v51, %v2263_v39 }
 0x4ee   : > { %v3393_v44 = vpop.f32.mrf.mxu0  ;;  %v3409_v45 = vpop.f32.mrf.mxu1 }
 0x4ef   : > { %3072 = vst [vmem:[%s4593_s12 + $0x28] sm:$0xff] %v3001_v40   ;;  %3080 = vst [vmem:[%s4593_s12 + $0x68] sm:$0xff] %v3041_v41   ;;  %v2996_v46 = vpack.c.bf16 %v2200_v42, %v2197_v36  ;;  %v3036_v47 = vpack.c.bf16 %v2264_v43, %v2261_v37  ;;  %v2221_v53 = vadd.f32 %v3393_v44, %v4784_v51 }
 0x4f0   : > { %v2212_v48 = vpop.f32.mrf.mxu0  ;;  %v2276_v49 = vpop.f32.mrf.mxu1  ;;  %v2285_v54 = vadd.f32 %v3409_v45, %v4784_v51 }
 0x4f1   : > { %3071 = vst [vmem:[%s4593_s12 + $0x20] sm:$0xff] %v2996_v46   ;;  %3079 = vst [vmem:[%s4593_s12 + $0x60] sm:$0xff] %v3036_v47   ;;  %v2213_v58 = vadd.f32 %v4784_v51, %v2212_v48  ;;  %v2277_v59 = vadd.f32 %v4784_v51, %v2276_v49 }
 0x4f2   : > { %v3394_v50 = vpop.f32.mrf.mxu0  ;;  %v3410_v52 = vpop.f32.mrf.mxu1 }
 0x4f3   : > { %v2224_v55 = vadd.f32 %v3394_v50, %v4784_v51  ;;  %v2288_v56 = vadd.f32 %v3410_v52, %v4784_v51 }
 0x4f4   : > { %v2215_v60 = vpop.f32.mrf.mxu0  ;;  %v2279_v61 = vpop.f32.mrf.mxu1 }
 0x4f5   : > { %v3011_v62 = vpack.c.bf16 %v2224_v55, %v2221_v53  ;;  %v3051_v63 = vpack.c.bf16 %v2288_v56, %v2285_v54  ;;  %v2216_v0 = vadd.f32 %v4784_v51, %v2215_v60  ;;  %v2280_v1 = vadd.f32 %v4784_v51, %v2279_v61 }
 0x4f7   : > { %3074 = vst [vmem:[%s4593_s12 + $0x38] sm:$0xff] %v3011_v62   ;;  %3082 = vst [vmem:[%s4593_s12 + $0x78] sm:$0xff] %v3051_v63   ;;  %v3006_v2 = vpack.c.bf16 %v2216_v0, %v2213_v58  ;;  %v3046_v57 = vpack.c.bf16 %v2280_v1, %v2277_v59 }
 0x4f9   : > { %3073 = vst [vmem:[%s4593_s12 + $0x30] sm:$0xff] %v3006_v2   ;;  %3081 = vst [vmem:[%s4593_s12 + $0x70] sm:$0xff] %v3046_v57  }
 0x4fa   : > { %4120 = shalt.err (!%p4117_p1)
}
 0x4fb   : > { %s4121_s10 = scalar_lea.hbm %s4836_s27, 2048  ;;  %s4125_s26 = scalar_lea.hbm %s5014_s4, 16384 }
 0x4fc   : > { %p4122_p11 = scmp.ne.s32.totalorder %s4836_s27, %s4121_s10  ;;  %p4126_p3 = scmp.lt.s32.totalorder %s4836_s27, %s5014_s4 }
 0x4fd   : > { %p4127_p2 = scmp.lt.s32.totalorder %s4125_s26, %s4121_s10 }
 0x4fe   : > { %p4123_p0 = pnand %p4122_p11, %p5015_p13 }
 0x4ff   : > { %p4128_p10 = por %p4127_p2, %p4126_p3 }
 0x500   : > { %p4124_p7 = pneg %p4123_p0 }
 0x502   : > { %p4129_p9 = pnand %p4128_p10, %p4124_p7 }
 0x504   : > { %4132 = shalt.err (!%p4129_p9)
}
 0x505   : > { %s4276_s18 = smov 64   ;;  %s4277_s15 = smov 128  }
 0x506   : > { %s4278_s24 = smov 4  }
 0x507   : > { %3443 = dma.vmem_to_hbm [thread:$0]  (%p5015_p13), %s4838_s9, 2048, %s4836_s27, %s4846_s1, %s4276_s18, %s4277_s15, %s4278_s24  }
 0x508 PF: > { %s5016_s29 = sld [smem:[#allocation18_spill]]  ;;  %p3473_p4 = scmp.ge.s32.totalorder %s4263_s22, 2 }
 0x509   : > { %s5017_s16 = sld [smem:[#allocation27_spill]] }
 0x50e   : > { %s2482_s13 = sand.u32 1, %s5016_s29  }
 0x50f   : > { %p5018_p5 = scmp.ne.s32.totalorder %s5017_s16, 0  ;;  %s2483_s30 = scalar_lea.sflag [#allocation5], %s2482_s13 }
 0x511   : > { %p3463_p6 = pnand %p3473_p4, %p5018_p5 }
 0x513   : > { %p3464_p12 = pneg %p3463_p6 }
 0x515   : > { %4206 = dma.done.wait (%p3464_p12), %s2483_s30, 2048  }
 0x516   : > { %4208 = vsyncadd (%p3464_p12), %s2483_s30, 4294965248  ;;  %s27_s22 = sadd.s32 1, %s4263_s22   ;;  %s5020_s30 = sld [smem:[#allocation19_spill]] }
 0x517   : > { %p4874_p8 = scmp.ge.s32.totalorder %s27_s22, 10   ;;  %s5021_s12 = sld [smem:[#allocation20_spill]] }
 0x518   : > { %s5022_s9 = sld [smem:[#allocation30_spill]]  ;;  %s5026_s10 = smov %s4219_s11 }
 0x519   : > { %s5023_s15 = sld [smem:[#allocation21_spill]]  ;;  %s5027_s11 = smov %s4491_s8 }
 0x51a   : > { %s5024_s28 = sld [smem:[#allocation28_spill]]  ;;  %s5028_s13 = smov %s4231_s14 }
 0x51b   : > { %s5025_s27 = sld [smem:[#allocation29_spill]]  ;;  %s5030_s16 = smov %s4243_s17 }
 0x51c   : > { %s5031_s17 = smov %s4488_s2  ;;  %s5032_s18 = smov %s4255_s20 }
 0x51d   : > { %s5033_s19 = smov %s4259_s21  ;;  %26 = sbr.rel (!%p4874_p8) target bundleno = 19 (0x13), region = 131 }
 0x51e   : > { %s5029_s14 = smov %s5022_s9 }
 0x520   : > { %s5034_s20 = smov %s5024_s28 }
 0x521   : > { %s5035_s21 = smov %s5025_s27 }
 0x522   :  { %2488 = vsyncpa [#allocation4], 1 }
 0x523   :  { %2490 = vsyncpa [#allocation4 + $0x1], 1 }
 0x524   :  { %2491 = vsyncpa [#allocation7], 1 }
 0x525   :  { %2492 = vsyncpa [#allocation10], 1 }
 0x526   :  { %2493 = vsyncpa [#allocation5], 1 }
 0x527   :  { %2495 = vsyncpa [#allocation5 + $0x1], 1 }

</bundles_post_ra>
